<compile_context>
chip_gen: v5e
topology: v5e:2x2
jax: 0.10.0
libtpu: 0.0.40
codegen_flags: <defaults>
</compile_context>

<pallas_src>
import jax
import jax.numpy as jnp
from jax.experimental import pallas as pl
from jax.experimental.pallas import tpu as pltpu

# ---- Model dimensions (small, consistent with the module) -------------------
BATCH = 8
HALF_IN = 256            # half_in_size = num_ftrs / 2
NUM_FTRS = 2 * HALF_IN   # model_ft.fc.in_features
LAYER_W = 256            # layer_width (scaled down from 512 for a small test)
NUM_CLASS = 10
OUT_PAD = 128            # lane-dense padded output width (multiple of 128)
BN_EPS = 1e-5

# Packed weight-slab column offsets (all multiples of 128 -> free static slices)
_WA0 = 0                          # [w1 | w3a | w2a | w4a] : 4*LAYER_W cols
_WB0 = 4 * LAYER_W                # [w2b | w3b | w4b]      : 3*LAYER_W cols
_WO0 = 7 * LAYER_W                # [wo1 | wo2 | wo3 | wo4]: 4*OUT_PAD cols
_WTOT = 7 * LAYER_W + 4 * OUT_PAD
_BTOT = 4 * LAYER_W + OUT_PAD     # bias slab: [b1 | b3 | b2 | b4 | bo_pad]


# ---- Pallas kernel -----------------------------------------------------------
def spinal_kernel(x_ref, w_ref, bias_ref, out_ref):
    LW = LAYER_W
    f32 = jnp.float32

    xa = x_ref[:, 0:HALF_IN]              # x[:, 0:half_in_size]          (bf16)
    xb = x_ref[:, HALF_IN:2 * HALF_IN]    # x[:, half_in_size:2*half_in]  (bf16)

    ba = bias_ref[:, 0:2 * LW]                    # [b1 | b3]  (f32, BATCH rows)
    bb = bias_ref[:, 2 * LW:4 * LW]               # [b2 | b4]
    bo = bias_ref[:, 4 * LW:4 * LW + OUT_PAD]     # padded fc_out bias

    # Two wide, mutually independent bf16 dots on the raw input halves, with
    # their biases fused as two full-vreg adds (off the serial chain).
    pa = jnp.dot(xa, w_ref[:, _WA0:_WA0 + 2 * LW],
                 preferred_element_type=f32) + ba          # [xa@w1+b1 | xa@w3a+b3]
    pb = jnp.dot(xb, w_ref[:, _WA0 + 2 * LW:_WA0 + 4 * LW],
                 preferred_element_type=f32) + bb          # [xb@w2a+b2 | xb@w4a+b4]

    # Serial spinal chain.  fc_out is four accumulating K=256 partial dots,
    # each issued as soon as its x_i is ready (no VMEM staging).
    x1 = jnp.maximum(pa[:, 0:LW], 0.0).astype(jnp.bfloat16)
    acc = jnp.dot(x1, w_ref[:, _WO0 + 0 * OUT_PAD:_WO0 + 1 * OUT_PAD],
                  preferred_element_type=f32)

    x2 = jnp.maximum(
        pb[:, 0:LW]
        + jnp.dot(x1, w_ref[:, _WB0 + 0 * LW:_WB0 + 1 * LW],
                  preferred_element_type=f32),
        0.0).astype(jnp.bfloat16)
    acc = acc + jnp.dot(x2, w_ref[:, _WO0 + 1 * OUT_PAD:_WO0 + 2 * OUT_PAD],
                        preferred_element_type=f32)

    x3 = jnp.maximum(
        pa[:, LW:2 * LW]
        + jnp.dot(x2, w_ref[:, _WB0 + 1 * LW:_WB0 + 2 * LW],
                  preferred_element_type=f32),
        0.0).astype(jnp.bfloat16)
    acc = acc + jnp.dot(x3, w_ref[:, _WO0 + 2 * OUT_PAD:_WO0 + 3 * OUT_PAD],
                        preferred_element_type=f32)

    x4 = jnp.maximum(
        pb[:, LW:2 * LW]
        + jnp.dot(x3, w_ref[:, _WB0 + 2 * LW:_WB0 + 3 * LW],
                  preferred_element_type=f32),
        0.0).astype(jnp.bfloat16)
    acc = acc + jnp.dot(x4, w_ref[:, _WO0 + 3 * OUT_PAD:_WO0 + 4 * OUT_PAD],
                        preferred_element_type=f32)

    out_ref[...] = (acc + bo).astype(out_ref.dtype)


def spinalnet_forward(x, params):
    """x: [BATCH, NUM_FTRS] float32. params: packed, BN-folded bf16/f32 slabs."""
    out_padded = pl.pallas_call(
        spinal_kernel,
        out_shape=jax.ShapeDtypeStruct((BATCH, OUT_PAD), jnp.float32),
        # No grid: single invocation, full arrays resident in VMEM (~1.3 MB).
        compiler_params=pltpu.CompilerParams(vmem_limit_bytes=16 << 20),
    )(x.astype(jnp.bfloat16), params["w"], params["bias"])
    # Padded lanes of wo/bo are zero; slice back to the real class count.
    return out_padded[:, :NUM_CLASS]


# ---- Deterministic parameter construction + BN folding + packing (JAX glue) --
def make_params(key):
    def linear_init(k, fan_in, fan_out):
        kw, kb = jax.random.split(k)
        bound = 1.0 / jnp.sqrt(fan_in)
        w = jax.random.uniform(kw, (fan_in, fan_out), jnp.float32, -bound, bound)
        b = jax.random.uniform(kb, (fan_out,), jnp.float32, -bound, bound)
        return w, b

    def bn_init(k, n):
        k1, k2, k3, k4 = jax.random.split(k, 4)
        gamma = 1.0 + 0.1 * jax.random.normal(k1, (n,), jnp.float32)
        beta = 0.1 * jax.random.normal(k2, (n,), jnp.float32)
        mean = 0.1 * jax.random.normal(k3, (n,), jnp.float32)
        var = 1.0 + 0.1 * jnp.abs(jax.random.normal(k4, (n,), jnp.float32))
        return gamma, beta, mean, var

    def fold(w, b, gamma, beta, mean, var):
        # BN(eval) after Linear: (xW + b)*s + (beta - mean*s),  s = gamma*rsqrt(var+eps)
        s = gamma / jnp.sqrt(var + BN_EPS)
        return w * s[None, :], b * s + beta - mean * s

    keys = jax.random.split(key, 12)
    raw = {}

    w1, b1 = linear_init(keys[0], HALF_IN, LAYER_W)
    g1, be1, m1, v1 = bn_init(keys[1], LAYER_W)
    raw["l1"] = (w1, b1, g1, be1, m1, v1)
    for i, name in enumerate(["l2", "l3", "l4"]):
        w, b = linear_init(keys[2 + 2 * i], HALF_IN + LAYER_W, LAYER_W)
        g, be, m, v = bn_init(keys[3 + 2 * i], LAYER_W)
        raw[name] = (w, b, g, be, m, v)
    wo, bo = linear_init(keys[8], 4 * LAYER_W, NUM_CLASS)

    fw1, fb1 = fold(*raw["l1"])
    fw2, fb2 = fold(*raw["l2"])
    fw3, fb3 = fold(*raw["l3"])
    fw4, fb4 = fold(*raw["l4"])
    folded = ((fw1, fb1), (fw2, fb2), (fw3, fb3), (fw4, fb4), (wo, bo))

    # A-slab: weights multiplying the raw input halves: [w1 | w3a | w2a | w4a]
    wa = jnp.concatenate(
        [fw1, fw3[:HALF_IN, :], fw2[:HALF_IN, :], fw4[:HALF_IN, :]], axis=1)
    # B-slab: weights multiplying the previous spinal activation: [w2b | w3b | w4b]
    wb = jnp.concatenate(
        [fw2[HALF_IN:, :], fw3[HALF_IN:, :], fw4[HALF_IN:, :]], axis=1)
    # fc_out weight: zero-pad to 128 lane-dense output columns, then repack the
    # four K=256 row-blocks as column blocks (for the split accumulating dots).
    wo_pad = jnp.zeros((4 * LAYER_W, OUT_PAD), jnp.float32).at[:, :NUM_CLASS].set(wo)
    wo_blk = jnp.concatenate(
        [wo_pad[i * LAYER_W:(i + 1) * LAYER_W, :] for i in range(4)], axis=1)
    # One consolidated bf16 weight slab: [wa | wb | wo_blk]  -> [256, 2304].
    w_slab = jnp.concatenate([wa, wb, wo_blk], axis=1).astype(jnp.bfloat16)
    assert w_slab.shape == (HALF_IN, _WTOT)

    # One f32 bias slab, pre-broadcast to BATCH sublanes: [b1 | b3 | b2 | b4 | bo_pad]
    bo_pad = jnp.zeros((OUT_PAD,), jnp.float32).at[:NUM_CLASS].set(bo)
    bias_row = jnp.concatenate([fb1, fb3, fb2, fb4, bo_pad])
    assert bias_row.shape == (_BTOT,)
    bias = jnp.broadcast_to(bias_row[None, :], (BATCH, _BTOT)) + 0.0  # materialize

    params = {"w": w_slab, "bias": bias}
    return params, raw, folded


# ---- Reference 1: mirrors the kernel's bf16-weight / f32-accumulate math -----
def reference_forward_bf16(x, folded):
    (fw1, fb1), (fw2, fb2), (fw3, fb3), (fw4, fb4), (wo, bo) = folded

    def bdot(a, w):
        return jnp.dot(a.astype(jnp.bfloat16), w.astype(jnp.bfloat16),
                       preferred_element_type=jnp.float32)

    xa = x[:, 0:HALF_IN]
    xb = x[:, HALF_IN:2 * HALF_IN]
    x1 = jnp.maximum(bdot(xa, fw1) + fb1, 0.0)
    x2 = jnp.maximum(bdot(jnp.concatenate([xb, x1], axis=1), fw2) + fb2, 0.0)
    x3 = jnp.maximum(bdot(jnp.concatenate([xa, x2], axis=1), fw3) + fb3, 0.0)
    x4 = jnp.maximum(bdot(jnp.concatenate([xb, x3], axis=1), fw4) + fb4, 0.0)
    h = jnp.concatenate([x1, x2, x3, x4], axis=1)
    return bdot(h, wo) + bo


# ---- Reference 2: unfolded f32 module (Linear -> BN(eval) -> ReLU) ------------
def reference_forward_f32(x, raw, out_lin):
    hp = jax.lax.Precision.HIGHEST

    def layer(inp, pack):
        w, b, g, be, m, v = pack
        y = jnp.dot(inp, w, precision=hp) + b
        y = (y - m) / jnp.sqrt(v + BN_EPS) * g + be
        return jnp.maximum(y, 0.0)

    xa = x[:, 0:HALF_IN]
    xb = x[:, HALF_IN:2 * HALF_IN]
    x1 = layer(xa, raw["l1"])
    x2 = layer(jnp.concatenate([xb, x1], axis=1), raw["l2"])
    x3 = layer(jnp.concatenate([xa, x2], axis=1), raw["l3"])
    x4 = layer(jnp.concatenate([xb, x3], axis=1), raw["l4"])
    wo, bo = out_lin
    h = jnp.concatenate([x1, x2, x3, x4], axis=1)
    return jnp.dot(h, wo, precision=hp) + bo


if __name__ == "__main__":
    key = jax.random.PRNGKey(0)
    kx, kp = jax.random.split(key)
    x = jax.random.normal(kx, (BATCH, NUM_FTRS), jnp.float32)

    params, raw, folded = make_params(kp)

    out = jax.block_until_ready(spinalnet_forward(x, params))
    assert out.shape == (BATCH, NUM_CLASS)

    # Tight check: same bf16-weight arithmetic, validates slab packing + kernel wiring.
    ref_b = jax.block_until_ready(reference_forward_bf16(x, folded))
    err_b = float(jnp.max(jnp.abs(out - ref_b)))
    assert jnp.allclose(out, ref_b, atol=2e-3, rtol=2e-3), err_b

    # Semantics check vs the unfolded f32 module; slack only covers the bf16 casts.
    ref_f = jax.block_until_ready(
        reference_forward_f32(x, raw, (folded[4][0], folded[4][1])))
    err_f = float(jnp.max(jnp.abs(out - ref_f)))
    assert err_f < 0.2, err_f

    print("KERNEL_OK")
</pallas_src>

<mosaic_0001>
module attributes {stable_mosaic.version = 11 : i64} {
  func.func @spinal_kernel(%arg0: memref<8x512xbf16, #tpu.memory_space<vmem>>, %arg1: memref<256x2304xbf16, #tpu.memory_space<vmem>>, %arg2: memref<8x1152xf32, #tpu.memory_space<vmem>>, %arg3: memref<8x128xf32, #tpu.memory_space<vmem>>) attributes {dimension_semantics = [], scalar_prefetch = 0 : i64, scratch_operands = 0 : i64, tpu.core_type = #tpu.core_type<tc>} {
    %c0 = arith.constant 0 : index
    %c0_0 = arith.constant 0 : index
    %0 = vector.load %arg0[%c0, %c0_0] : memref<8x512xbf16, #tpu.memory_space<vmem>>, vector<8x256xbf16>
    %c0_1 = arith.constant 0 : index
    %c256 = arith.constant 256 : index
    %1 = vector.load %arg0[%c0_1, %c256] : memref<8x512xbf16, #tpu.memory_space<vmem>>, vector<8x256xbf16>
    %c0_2 = arith.constant 0 : index
    %c0_3 = arith.constant 0 : index
    %2 = vector.load %arg2[%c0_2, %c0_3] : memref<8x1152xf32, #tpu.memory_space<vmem>>, vector<8x512xf32>
    %c0_4 = arith.constant 0 : index
    %c512 = arith.constant 512 : index
    %3 = vector.load %arg2[%c0_4, %c512] : memref<8x1152xf32, #tpu.memory_space<vmem>>, vector<8x512xf32>
    %c0_5 = arith.constant 0 : index
    %c1024 = arith.constant 1024 : index
    %4 = vector.load %arg2[%c0_5, %c1024] : memref<8x1152xf32, #tpu.memory_space<vmem>>, vector<8x128xf32>
    %c0_6 = arith.constant 0 : index
    %c0_7 = arith.constant 0 : index
    %5 = vector.load %arg1[%c0_6, %c0_7] : memref<256x2304xbf16, #tpu.memory_space<vmem>>, vector<256x512xbf16>
    %cst = arith.constant dense<0.000000e+00> : vector<8x512xf32>
    %6 = tpu.matmul %0, %5, %cst {dimension_numbers = #tpu.dot_dimension_numbers<[1], [0], [0], [1], [0, 0, 1, 1], [], []>} : vector<8x256xbf16>, vector<256x512xbf16>, vector<8x512xf32> -> vector<8x512xf32>
    %7 = arith.addf %6, %2 : vector<8x512xf32>
    %c0_8 = arith.constant 0 : index
    %c512_9 = arith.constant 512 : index
    %8 = vector.load %arg1[%c0_8, %c512_9] : memref<256x2304xbf16, #tpu.memory_space<vmem>>, vector<256x512xbf16>
    %cst_10 = arith.constant dense<0.000000e+00> : vector<8x512xf32>
    %9 = tpu.matmul %1, %8, %cst_10 {dimension_numbers = #tpu.dot_dimension_numbers<[1], [0], [0], [1], [0, 0, 1, 1], [], []>} : vector<8x256xbf16>, vector<256x512xbf16>, vector<8x512xf32> -> vector<8x512xf32>
    %10 = arith.addf %9, %3 : vector<8x512xf32>
    %11 = vector.extract_strided_slice %7 {offsets = [0, 0], sizes = [8, 256], strides = [1, 1]} : vector<8x512xf32> to vector<8x256xf32>
    %cst_11 = arith.constant 0.000000e+00 : f32
    %12 = vector.broadcast %cst_11 : f32 to vector<8x256xf32>
    %13 = arith.maximumf %11, %12 : vector<8x256xf32>
    %14 = arith.truncf %13 : vector<8x256xf32> to vector<8x256xbf16>
    %c0_12 = arith.constant 0 : index
    %c1792 = arith.constant 1792 : index
    %15 = vector.load %arg1[%c0_12, %c1792] : memref<256x2304xbf16, #tpu.memory_space<vmem>>, vector<256x128xbf16>
    %cst_13 = arith.constant dense<0.000000e+00> : vector<8x128xf32>
    %16 = tpu.matmul %14, %15, %cst_13 {dimension_numbers = #tpu.dot_dimension_numbers<[1], [0], [0], [1], [0, 0, 1, 1], [], []>} : vector<8x256xbf16>, vector<256x128xbf16>, vector<8x128xf32> -> vector<8x128xf32>
    %17 = vector.extract_strided_slice %10 {offsets = [0, 0], sizes = [8, 256], strides = [1, 1]} : vector<8x512xf32> to vector<8x256xf32>
    %c0_14 = arith.constant 0 : index
    %c1024_15 = arith.constant 1024 : index
    %18 = vector.load %arg1[%c0_14, %c1024_15] : memref<256x2304xbf16, #tpu.memory_space<vmem>>, vector<256x256xbf16>
    %cst_16 = arith.constant dense<0.000000e+00> : vector<8x256xf32>
    %19 = tpu.matmul %14, %18, %cst_16 {dimension_numbers = #tpu.dot_dimension_numbers<[1], [0], [0], [1], [0, 0, 1, 1], [], []>} : vector<8x256xbf16>, vector<256x256xbf16>, vector<8x256xf32> -> vector<8x256xf32>
    %20 = arith.addf %17, %19 : vector<8x256xf32>
    %cst_17 = arith.constant 0.000000e+00 : f32
    %21 = vector.broadcast %cst_17 : f32 to vector<8x256xf32>
    %22 = arith.maximumf %20, %21 : vector<8x256xf32>
    %23 = arith.truncf %22 : vector<8x256xf32> to vector<8x256xbf16>
    %c0_18 = arith.constant 0 : index
    %c1920 = arith.constant 1920 : index
    %24 = vector.load %arg1[%c0_18, %c1920] : memref<256x2304xbf16, #tpu.memory_space<vmem>>, vector<256x128xbf16>
    %cst_19 = arith.constant dense<0.000000e+00> : vector<8x128xf32>
    %25 = tpu.matmul %23, %24, %cst_19 {dimension_numbers = #tpu.dot_dimension_numbers<[1], [0], [0], [1], [0, 0, 1, 1], [], []>} : vector<8x256xbf16>, vector<256x128xbf16>, vector<8x128xf32> -> vector<8x128xf32>
    %26 = arith.addf %16, %25 : vector<8x128xf32>
    %27 = vector.extract_strided_slice %7 {offsets = [0, 256], sizes = [8, 256], strides = [1, 1]} : vector<8x512xf32> to vector<8x256xf32>
    %c0_20 = arith.constant 0 : index
    %c1280 = arith.constant 1280 : index
    %28 = vector.load %arg1[%c0_20, %c1280] : memref<256x2304xbf16, #tpu.memory_space<vmem>>, vector<256x256xbf16>
    %cst_21 = arith.constant dense<0.000000e+00> : vector<8x256xf32>
    %29 = tpu.matmul %23, %28, %cst_21 {dimension_numbers = #tpu.dot_dimension_numbers<[1], [0], [0], [1], [0, 0, 1, 1], [], []>} : vector<8x256xbf16>, vector<256x256xbf16>, vector<8x256xf32> -> vector<8x256xf32>
    %30 = arith.addf %27, %29 : vector<8x256xf32>
    %cst_22 = arith.constant 0.000000e+00 : f32
    %31 = vector.broadcast %cst_22 : f32 to vector<8x256xf32>
    %32 = arith.maximumf %30, %31 : vector<8x256xf32>
    %33 = arith.truncf %32 : vector<8x256xf32> to vector<8x256xbf16>
    %c0_23 = arith.constant 0 : index
    %c2048 = arith.constant 2048 : index
    %34 = vector.load %arg1[%c0_23, %c2048] : memref<256x2304xbf16, #tpu.memory_space<vmem>>, vector<256x128xbf16>
    %cst_24 = arith.constant dense<0.000000e+00> : vector<8x128xf32>
    %35 = tpu.matmul %33, %34, %cst_24 {dimension_numbers = #tpu.dot_dimension_numbers<[1], [0], [0], [1], [0, 0, 1, 1], [], []>} : vector<8x256xbf16>, vector<256x128xbf16>, vector<8x128xf32> -> vector<8x128xf32>
    %36 = arith.addf %26, %35 : vector<8x128xf32>
    %37 = vector.extract_strided_slice %10 {offsets = [0, 256], sizes = [8, 256], strides = [1, 1]} : vector<8x512xf32> to vector<8x256xf32>
    %c0_25 = arith.constant 0 : index
    %c1536 = arith.constant 1536 : index
    %38 = vector.load %arg1[%c0_25, %c1536] : memref<256x2304xbf16, #tpu.memory_space<vmem>>, vector<256x256xbf16>
    %cst_26 = arith.constant dense<0.000000e+00> : vector<8x256xf32>
    %39 = tpu.matmul %33, %38, %cst_26 {dimension_numbers = #tpu.dot_dimension_numbers<[1], [0], [0], [1], [0, 0, 1, 1], [], []>} : vector<8x256xbf16>, vector<256x256xbf16>, vector<8x256xf32> -> vector<8x256xf32>
    %40 = arith.addf %37, %39 : vector<8x256xf32>
    %cst_27 = arith.constant 0.000000e+00 : f32
    %41 = vector.broadcast %cst_27 : f32 to vector<8x256xf32>
    %42 = arith.maximumf %40, %41 : vector<8x256xf32>
    %43 = arith.truncf %42 : vector<8x256xf32> to vector<8x256xbf16>
    %c0_28 = arith.constant 0 : index
    %c2176 = arith.constant 2176 : index
    %44 = vector.load %arg1[%c0_28, %c2176] : memref<256x2304xbf16, #tpu.memory_space<vmem>>, vector<256x128xbf16>
    %cst_29 = arith.constant dense<0.000000e+00> : vector<8x128xf32>
    %45 = tpu.matmul %43, %44, %cst_29 {dimension_numbers = #tpu.dot_dimension_numbers<[1], [0], [0], [1], [0, 0, 1, 1], [], []>} : vector<8x256xbf16>, vector<256x128xbf16>, vector<8x128xf32> -> vector<8x128xf32>
    %46 = arith.addf %36, %45 : vector<8x128xf32>
    %47 = arith.addf %46, %4 : vector<8x128xf32>
    %c0_30 = arith.constant 0 : index
    %c0_31 = arith.constant 0 : index
    %48 = vector.load %arg3[%c0_30, %c0_31] : memref<8x128xf32, #tpu.memory_space<vmem>>, vector<8x128xf32>
    tpu.vector_store %arg3[%c0_30, %c0_31], %47 {strides = array<i32>} : memref<8x128xf32, #tpu.memory_space<vmem>>, vector<8x128xf32>,
    return
  }
}

</mosaic_0001>

<bundles_post_ra>
// kernel: tpu_custom_call.1
= control target key start
LH: loop header
LB: loop body
LE: loop exit
PB: predicated region body
PF: predicated region fallthrough
CT: control target
= control target key end

     0   :  { %8 = vsyncpa [#allocation3], 0  ;;  %s4088_s0 = inlined_call_operand.hbm [shape: bf16[8,512], index: 0, kind: input, shape index: {}]   ;;  %s4089_s1 = inlined_call_operand.hbm [shape: bf16[256,2304], index: 1, kind: input, shape index: {}]   ;;  %s4090_s2 = inlined_call_operand.hbm [shape: f32[8,1152], index: 2, kind: input, shape index: {}]   ;;  %s4091_s3 = inlined_call_operand.hbm [shape: f32[8,128], index: 3, kind: output, shape index: {}]  }
   0x1   :  { %9 = vsyncpa [#allocation6], 0  ;;  %s26_s14 = sshll.u32 %s4089_s1, 4  ;;  %s27_s14 = int_to_ptr.hbm [resolvable:$true] %s26_s14 }
   0x2   :  { %10 = vsyncpa [#allocation4], 0  ;;  %s3999_s15 = smov [#allocation5]   ;;  %s16_s19 = sshll.u32 %s4088_s0, 4  ;;  %s17_s19 = int_to_ptr.hbm [resolvable:$true] %s16_s19 }
   0x3   :  { %s28_s16 = sshll.u32 %s3999_s15, 4  ;;  %s4000_s20 = smov 1152   ;;  %s29_s16 = int_to_ptr.vmem [resolvable:$true] %s28_s16 }
   0x4   :  { %s4001_s21 = smov 72   ;;  %s4002_s22 = smov [#allocation2]  }
   0x5   :  { %34 = dma.hbm_to_vmem [thread:$0]  %s27_s14, 36864, %s29_s16, [#allocation6], %s4000_s20, %s4000_s20, %s4001_s21  }
   0x6   :  { %s18_s23 = sshll.u32 %s4002_s22, 4  ;;  %s40_s26 = sshll.u32 %s4090_s2, 4  ;;  %s19_s23 = int_to_ptr.vmem [resolvable:$true] %s18_s23  ;;  %s41_s26 = int_to_ptr.hbm [resolvable:$true] %s40_s26 }
   0x7   :  { %21 = dma.hbm_to_vmem [thread:$0]  %s17_s19, 256, %s19_s23, [#allocation3]  }
   0x8   :  { %s4003_s1 = smov [#allocation7]  }
   0x9   :  { %s42_s27 = sshll.u32 %s4003_s1, 4  ;;  %s43_s27 = int_to_ptr.vmem [resolvable:$true] %s42_s27 }
   0xa   :  { %45 = dma.hbm_to_vmem [thread:$0]  %s41_s26, 1152, %s43_s27, [#allocation6]  }
   0xb   :  { %3993 = dma.done.wait [#allocation3], 256  }
   0xc   :  { %3994 = vsyncadd [#allocation3], 4294967040 }
   0xd   :  { %3995 = dma.done.wait [#allocation6], 38016  }
   0xe   :  { %3996 = vsyncadd [#allocation6], 4294929280  ;;  %v2565_v0 = vld [vmem:[#allocation5 + $0x3f0] sm:$0xf]  ;;  %v3633_v1 = vld [vmem:[#allocation5 + $0x434] sm:$0xf0] }
   0xf   :  { %v2693_v2 = vld [vmem:[#allocation5 + $0x870] sm:$0xf]  ;;  %v2566_v3 = vor.u32 %v3633_v1, %v2565_v0  ;;  %v3665_v4 = vld [vmem:[#allocation5 + $0x8b4] sm:$0xf0]  ;;  %v3631_v5 = vld [vmem:[#allocation5 + $0x3f4] sm:$0xf] }
  0x10   :  { %v2567_v6 = vld [vmem:[#allocation5 + $0x438] sm:$0xf0]  ;;  %v2694_v7 = vor.u32 %v3665_v4, %v2693_v2  ;;  %v3663_v9 = vld [vmem:[#allocation5 + $0x874] sm:$0xf]  ;;  %v2549_v11 = vld [vmem:[#allocation5 + $0x360] sm:$0xf] }
  0x11   :  { %v2570_v8 = vor.u32 %v3631_v5, %v2567_v6  ;;  %v2695_v10 = vld [vmem:[#allocation5 + $0x8b8] sm:$0xf0]  ;;  %460 = vmatpush.bf16.msra.mxu0 %v2566_v3  ;;  %v3629_v13 = vld [vmem:[#allocation5 + $0x3a4] sm:$0xf0]  ;;  %v2677_v14 = vld [vmem:[#allocation5 + $0x7e0] sm:$0xf] }
  0x12   :  { %v2698_v12 = vor.u32 %v3663_v9, %v2695_v10  ;;  %v3661_v15 = vld [vmem:[#allocation5 + $0x824] sm:$0xf0]  ;;  %473 = vmatpush.bf16.msra.mxu1 %v2694_v7  ;;  %v2550_v16 = vor.u32 %v3629_v13, %v2549_v11  ;;  %v3627_v18 = vld [vmem:[#allocation5 + $0x364] sm:$0xf]  ;;  %v2551_v19 = vld [vmem:[#allocation5 + $0x3a8] sm:$0xf0] }
  0x13   :  { %486 = vmatpush.bf16.msra.mxu2 %v2570_v8  ;;  %v2678_v17 = vor.u32 %v3661_v15, %v2677_v14  ;;  %v3659_v20 = vld [vmem:[#allocation5 + $0x7e4] sm:$0xf]  ;;  %v2554_v21 = vor.u32 %v3627_v18, %v2551_v19  ;;  %v2679_v22 = vld [vmem:[#allocation5 + $0x828] sm:$0xf0]  ;;  %v2533_v23 = vld [vmem:[#allocation5 + $0x2d0] sm:$0xf] }
  0x14   :  { %499 = vmatpush.bf16.msra.mxu3 %v2698_v12  ;;  %v3625_v24 = vld [vmem:[#allocation5 + $0x314] sm:$0xf0]  ;;  %v2682_v25 = vor.u32 %v3659_v20, %v2679_v22  ;;  %v2661_v26 = vld [vmem:[#allocation5 + $0x750] sm:$0xf]  ;;  %v3623_v28 = vld [vmem:[#allocation5 + $0x2d4] sm:$0xf] }
  0x15   :  { %v3657_v27 = vld [vmem:[#allocation5 + $0x794] sm:$0xf0]  ;;  %461 = vmatpush.bf16.msra.mxu0 %v2550_v16  ;;  %v2534_v29 = vor.u32 %v3625_v24, %v2533_v23  ;;  %v2535_v30 = vld [vmem:[#allocation5 + $0x318] sm:$0xf0]  ;;  %v3655_v31 = vld [vmem:[#allocation5 + $0x754] sm:$0xf] }
  0x16   :  { %v2663_v32 = vld [vmem:[#allocation5 + $0x798] sm:$0xf0]  ;;  %474 = vmatpush.bf16.msra.mxu1 %v2678_v17  ;;  %v2662_v33 = vor.u32 %v3657_v27, %v2661_v26  ;;  %v2538_v34 = vor.u32 %v3623_v28, %v2535_v30  ;;  %v2517_v35 = vld [vmem:[#allocation5 + $0x240] sm:$0xf]  ;;  %v3621_v36 = vld [vmem:[#allocation5 + $0x284] sm:$0xf0] }
  0x17   :  { %487 = vmatpush.bf16.msra.mxu2 %v2554_v21  ;;  %v2645_v37 = vld [vmem:[#allocation5 + $0x6c0] sm:$0xf]  ;;  %v2666_v38 = vor.u32 %v3655_v31, %v2663_v32  ;;  %v3653_v39 = vld [vmem:[#allocation5 + $0x704] sm:$0xf0]  ;;  %v3619_v40 = vld [vmem:[#allocation5 + $0x244] sm:$0xf]  ;;  %v2518_v44 = vor.u32 %v3621_v36, %v2517_v35 }
  0x18   :  { %500 = vmatpush.bf16.msra.mxu3 %v2682_v25  ;;  %v2519_v41 = vld [vmem:[#allocation5 + $0x288] sm:$0xf0]  ;;  %v3651_v42 = vld [vmem:[#allocation5 + $0x6c4] sm:$0xf]  ;;  %v2646_v45 = vor.u32 %v3653_v39, %v2645_v37  ;;  %v2501_v47 = vld [vmem:[#allocation5 + $0x1b0] sm:$0xf] }
  0x19   :  { %v2647_v43 = vld [vmem:[#allocation5 + $0x708] sm:$0xf0]  ;;  %462 = vmatpush.bf16.msra.mxu0 %v2534_v29  ;;  %v2522_v46 = vor.u32 %v3619_v40, %v2519_v41  ;;  %v3617_v48 = vld [vmem:[#allocation5 + $0x1f4] sm:$0xf0]  ;;  %v2629_v49 = vld [vmem:[#allocation5 + $0x630] sm:$0xf] }
  0x1a   :  { %475 = vmatpush.bf16.msra.mxu1 %v2662_v33  ;;  %v2650_v50 = vor.u32 %v3651_v42, %v2647_v43  ;;  %v3649_v51 = vld [vmem:[#allocation5 + $0x674] sm:$0xf0]  ;;  %v3615_v52 = vld [vmem:[#allocation5 + $0x1b4] sm:$0xf]  ;;  %v2503_v53 = vld [vmem:[#allocation5 + $0x1f8] sm:$0xf0]  ;;  %v2502_v56 = vor.u32 %v3617_v48, %v2501_v47 }
  0x1b   :  { %488 = vmatpush.bf16.msra.mxu2 %v2538_v34  ;;  %v3647_v54 = vld [vmem:[#allocation5 + $0x634] sm:$0xf]  ;;  %v2631_v55 = vld [vmem:[#allocation5 + $0x678] sm:$0xf0]  ;;  %v2630_v57 = vor.u32 %v3649_v51, %v2629_v49  ;;  %v2506_v58 = vor.u32 %v3615_v52, %v2503_v53  ;;  %v2485_v59 = vld [vmem:[#allocation5 + $0x120] sm:$0xf] }
  0x1c   :  { %501 = vmatpush.bf16.msra.mxu3 %v2666_v38  ;;  %v3613_v60 = vld [vmem:[#allocation5 + $0x164] sm:$0xf0]  ;;  %v2613_v61 = vld [vmem:[#allocation5 + $0x5a0] sm:$0xf]  ;;  %v2634_v62 = vor.u32 %v3647_v54, %v2631_v55  ;;  %v3611_v0 = vld [vmem:[#allocation5 + $0x124] sm:$0xf] }
  0x1d   :  { %463 = vmatpush.bf16.msra.mxu0 %v2518_v44  ;;  %v3645_v63 = vld [vmem:[#allocation5 + $0x5e4] sm:$0xf0]  ;;  %v2487_v1 = vld [vmem:[#allocation5 + $0x168] sm:$0xf0]  ;;  %v3643_v2 = vld [vmem:[#allocation5 + $0x5a4] sm:$0xf]  ;;  %v2486_v4 = vor.u32 %v3613_v60, %v2485_v59 }
  0x1e   :  { %476 = vmatpush.bf16.msra.mxu1 %v2646_v45  ;;  %v2615_v3 = vld [vmem:[#allocation5 + $0x5e8] sm:$0xf0]  ;;  %v2614_v5 = vor.u32 %v3645_v63, %v2613_v61  ;;  %v2490_v6 = vor.u32 %v3611_v0, %v2487_v1  ;;  %v2469_v7 = vld [vmem:[#allocation5 + $0x90] sm:$0xf]  ;;  %v3609_v8 = vld [vmem:[#allocation5 + $0xd4] sm:$0xf0] }
  0x1f   :  { %489 = vmatpush.bf16.msra.mxu2 %v2522_v46  ;;  %v2597_v9 = vld [vmem:[#allocation5 + $0x510] sm:$0xf]  ;;  %v2618_v10 = vor.u32 %v3643_v2, %v2615_v3  ;;  %v3641_v11 = vld [vmem:[#allocation5 + $0x554] sm:$0xf0]  ;;  %v3607_v12 = vld [vmem:[#allocation5 + $0x94] sm:$0xf]  ;;  %v2470_v16 = vor.u32 %v3609_v8, %v2469_v7 }
  0x20   :  { %502 = vmatpush.bf16.msra.mxu3 %v2650_v50  ;;  %v2471_v13 = vld [vmem:[#allocation5 + $0xd8] sm:$0xf0]  ;;  %v3639_v14 = vld [vmem:[#allocation5 + $0x514] sm:$0xf]  ;;  %v2453_v17 = vld [vmem:[#allocation5] sm:$0xf]  ;;  %v2598_v19 = vor.u32 %v3641_v11, %v2597_v9 }
  0x21   :  { %464 = vmatpush.bf16.msra.mxu0 %v2502_v56  ;;  %v2599_v15 = vld [vmem:[#allocation5 + $0x558] sm:$0xf0]  ;;  %v58_v18 = vld [vmem:[#allocation2] sm:$0xff]  ;;  %v2474_v20 = vor.u32 %v3607_v12, %v2471_v13  ;;  %v3605_v21 = vld [vmem:[#allocation5 + $0x44] sm:$0xf0]  ;;  %s4004_s0 = smov [#allocation8]  }
  0x22   :  { %477 = vmatpush.bf16.msra.mxu1 %v2630_v57  ;;  %v2581_v22 = vld [vmem:[#allocation5 + $0x480] sm:$0xf]  ;;  %v3637_v23 = vld [vmem:[#allocation5 + $0x4c4] sm:$0xf0]  ;;  %v2602_v24 = vor.u32 %v3639_v14, %v2599_v15  ;;  %v3603_v25 = vld [vmem:[#allocation5 + $0x4] sm:$0xf]  ;;  %v134_v29 = vunpack.c.l.b16 %v58_v18  ;;  %v2454_v32 = vor.u32 %v3605_v21, %v2453_v17  ;;  %v135_v33 = vunpack.c.h.b16 %v58_v18 }
  0x23   :  { %490 = vmatpush.bf16.msra.mxu2 %v2506_v58  ;;  %v2455_v26 = vld [vmem:[#allocation5 + $0x48] sm:$0xf0]  ;;  %v3635_v27 = vld [vmem:[#allocation5 + $0x484] sm:$0xf]  ;;  %v3632_v30 = vld [vmem:[#allocation5 + $0x3fc] sm:$0xf]  ;;  %v2582_v36 = vor.u32 %v3637_v23, %v2581_v22 }
  0x24   :  { %503 = vmatpush.bf16.msra.mxu3 %v2634_v62  ;;  %v2583_v28 = vld [vmem:[#allocation5 + $0x4c8] sm:$0xf0]  ;;  %v2575_v31 = vld [vmem:[#allocation5 + $0x440] sm:$0xf0]  ;;  %v3664_v34 = vld [vmem:[#allocation5 + $0x87c] sm:$0xf]  ;;  %v2458_v37 = vor.u32 %v3603_v25, %v2455_v26  ;;  %v4034_v43 = vpack.c.b16 %v134_v29, %v134_v29  ;;  %v4036_v48 = vpack.c.b16 %v135_v33, %v135_v33 }
  0x25   :  { %465 = vmatpush.bf16.msra.mxu0 %v2486_v4  ;;  %v2703_v35 = vld [vmem:[#allocation5 + $0x8c0] sm:$0xf0]  ;;  %v2586_v38 = vor.u32 %v3635_v27, %v2583_v28  ;;  %v2578_v39 = vor.u32 %v3632_v30, %v2575_v31  ;;  %v3628_v40 = vld [vmem:[#allocation5 + $0x36c] sm:$0xf]  ;;  %v2573_v41 = vld [vmem:[#allocation5 + $0x3f8] sm:$0xf] }
  0x26   :  { %478 = vmatpush.bf16.msra.mxu1 %v2614_v5  ;;  %v3634_v42 = vld [vmem:[#allocation5 + $0x43c] sm:$0xf0]  ;;  %v2559_v44 = vld [vmem:[#allocation5 + $0x3b0] sm:$0xf0]  ;;  %v2706_v45 = vor.u32 %v3664_v34, %v2703_v35  ;;  %v2701_v46 = vld [vmem:[#allocation5 + $0x878] sm:$0xf] }
  0x27   :  { %491 = vmatpush.bf16.msra.mxu2 %v2490_v6  ;;  %v3666_v47 = vld [vmem:[#allocation5 + $0x8bc] sm:$0xf0]  ;;  %v3660_v49 = vld [vmem:[#allocation5 + $0x7ec] sm:$0xf]  ;;  %v2687_v50 = vld [vmem:[#allocation5 + $0x830] sm:$0xf0]  ;;  %v2574_v51 = vor.u32 %v3634_v42, %v2573_v41  ;;  %v2562_v52 = vor.u32 %v3628_v40, %v2559_v44 }
  0x28   :  { %504 = vmatpush.bf16.msra.mxu3 %v2618_v10  ;;  %v3624_v53 = vld [vmem:[#allocation5 + $0x2dc] sm:$0xf]  ;;  %v2557_v54 = vld [vmem:[#allocation5 + $0x368] sm:$0xf]  ;;  %v3630_v55 = vld [vmem:[#allocation5 + $0x3ac] sm:$0xf0]  ;;  %v2702_v56 = vor.u32 %v3666_v47, %v2701_v46  ;;  %v2690_v58 = vor.u32 %v3660_v49, %v2687_v50 }
  0x29   :  { %466 = vmatpush.bf16.msra.mxu0 %v2470_v16  ;;  %v2543_v57 = vld [vmem:[#allocation5 + $0x320] sm:$0xf0]  ;;  %v2685_v59 = vld [vmem:[#allocation5 + $0x7e8] sm:$0xf]  ;;  %v3662_v60 = vld [vmem:[#allocation5 + $0x82c] sm:$0xf0]  ;;  %v2558_v63 = vor.u32 %v3630_v55, %v2557_v54 }
  0x2a   :  { %479 = vmatpush.bf16.msra.mxu1 %v2598_v19  ;;  %v3656_v61 = vld [vmem:[#allocation5 + $0x75c] sm:$0xf]  ;;  %v2671_v62 = vld [vmem:[#allocation5 + $0x7a0] sm:$0xf0]  ;;  %v2546_v0 = vor.u32 %v3624_v53, %v2543_v57  ;;  %v3620_v1 = vld [vmem:[#allocation5 + $0x24c] sm:$0xf]  ;;  %v2686_v4 = vor.u32 %v3662_v60, %v2685_v59 }
  0x2b   :  { %492 = vmatpush.bf16.msra.mxu2 %v2474_v20  ;;  %v2541_v2 = vld [vmem:[#allocation5 + $0x2d8] sm:$0xf]  ;;  %v3626_v3 = vld [vmem:[#allocation5 + $0x31c] sm:$0xf0]  ;;  %v2527_v5 = vld [vmem:[#allocation5 + $0x290] sm:$0xf0]  ;;  %v2674_v6 = vor.u32 %v3656_v61, %v2671_v62 }
  0x2c   :  { %505 = vmatpush.bf16.msra.mxu3 %v2602_v24  ;;  %v2669_v7 = vld [vmem:[#allocation5 + $0x758] sm:$0xf]  ;;  %v3658_v8 = vld [vmem:[#allocation5 + $0x79c] sm:$0xf0]  ;;  %v3652_v9 = vld [vmem:[#allocation5 + $0x6cc] sm:$0xf]  ;;  %v2542_v11 = vor.u32 %v3626_v3, %v2541_v2  ;;  %v2530_v12 = vor.u32 %v3620_v1, %v2527_v5 }
  0x2d   :  { %467 = vmatpush.bf16.msra.mxu0 %v2454_v32  ;;  %v2655_v10 = vld [vmem:[#allocation5 + $0x710] sm:$0xf0]  ;;  %v3616_v13 = vld [vmem:[#allocation5 + $0x1bc] sm:$0xf]  ;;  %v2525_v14 = vld [vmem:[#allocation5 + $0x248] sm:$0xf]  ;;  %v2670_v16 = vor.u32 %v3658_v8, %v2669_v7 }
  0x2e   :  { %480 = vmatpush.bf16.msra.mxu1 %v2582_v36  ;;  %v3622_v15 = vld [vmem:[#allocation5 + $0x28c] sm:$0xf0]  ;;  %v2511_v17 = vld [vmem:[#allocation5 + $0x200] sm:$0xf0]  ;;  %v2658_v18 = vor.u32 %v3652_v9, %v2655_v10  ;;  %v2653_v19 = vld [vmem:[#allocation5 + $0x6c8] sm:$0xf] }
  0x2f   :  { %493 = vmatpush.bf16.msra.mxu2 %v2458_v37  ;;  %v3654_v20 = vld [vmem:[#allocation5 + $0x70c] sm:$0xf0]  ;;  %v3648_v21 = vld [vmem:[#allocation5 + $0x63c] sm:$0xf]  ;;  %v2639_v22 = vld [vmem:[#allocation5 + $0x680] sm:$0xf0]  ;;  %v2526_v23 = vor.u32 %v3622_v15, %v2525_v14  ;;  %v2514_v24 = vor.u32 %v3616_v13, %v2511_v17 }
  0x30   :  { %506 = vmatpush.bf16.msra.mxu3 %v2586_v38  ;;  %468 = vmatmul.bf16.vlgmr.msra.gmra.mxu0 %v4034_v43  ;;  %v3612_v25 = vld [vmem:[#allocation5 + $0x12c] sm:$0xf]  ;;  %v2509_v26 = vld [vmem:[#allocation5 + $0x1b8] sm:$0xf]  ;;  %v3618_v27 = vld [vmem:[#allocation5 + $0x1fc] sm:$0xf0]  ;;  %v2654_v28 = vor.u32 %v3654_v20, %v2653_v19  ;;  %v2642_v30 = vor.u32 %v3648_v21, %v2639_v22 }
  0x31   :  { %481 = vmatmul.bf16.vlgmr.msra.gmra.mxu1 %v4036_v48  ;;  %512 = vmatpush.bf16.msrb.mxu0 %v2574_v51  ;;  %v2495_v29 = vld [vmem:[#allocation5 + $0x170] sm:$0xf0]  ;;  %v2637_v31 = vld [vmem:[#allocation5 + $0x638] sm:$0xf]  ;;  %v3650_v32 = vld [vmem:[#allocation5 + $0x67c] sm:$0xf0]  ;;  %v2510_v35 = vor.u32 %v3618_v27, %v2509_v26 }
  0x32   :  { %494 = vmatmul.bf16.vlgmr.msra.gmra.mxu2 %v4034_v43  ;;  %525 = vmatpush.bf16.msrb.mxu1 %v2702_v56  ;;  %v3644_v33 = vld [vmem:[#allocation5 + $0x5ac] sm:$0xf]  ;;  %v2623_v34 = vld [vmem:[#allocation5 + $0x5f0] sm:$0xf0]  ;;  %v2498_v36 = vor.u32 %v3612_v25, %v2495_v29  ;;  %v3608_v37 = vld [vmem:[#allocation5 + $0x9c] sm:$0xf]  ;;  %v2638_v40 = vor.u32 %v3650_v32, %v2637_v31 }
  0x33   :  { %538 = vmatpush.bf16.msrb.mxu2 %v2578_v39  ;;  %507 = vmatmul.bf16.vlgmr.msra.gmra.mxu3 %v4036_v48  ;;  %v2493_v38 = vld [vmem:[#allocation5 + $0x128] sm:$0xf]  ;;  %v3614_v39 = vld [vmem:[#allocation5 + $0x16c] sm:$0xf0]  ;;  %v2479_v41 = vld [vmem:[#allocation5 + $0xe0] sm:$0xf0]  ;;  %v2626_v42 = vor.u32 %v3644_v33, %v2623_v34 }
  0x34   :  { %551 = vmatpush.bf16.msrb.mxu3 %v2706_v45  ;;  %v2621_v44 = vld [vmem:[#allocation5 + $0x5a8] sm:$0xf]  ;;  %v3646_v45 = vld [vmem:[#allocation5 + $0x5ec] sm:$0xf0]  ;;  %v3640_v46 = vld [vmem:[#allocation5 + $0x51c] sm:$0xf]  ;;  %v2494_v50 = vor.u32 %v3614_v39, %v2493_v38  ;;  %v2482_v51 = vor.u32 %v3608_v37, %v2479_v41 }
  0x35   :  { %513 = vmatpush.bf16.msrb.mxu0 %v2558_v63  ;;  %v2607_v47 = vld [vmem:[#allocation5 + $0x560] sm:$0xf0]  ;;  %v3604_v49 = vld [vmem:[#allocation5 + $0xc] sm:$0xf]  ;;  %v2477_v53 = vld [vmem:[#allocation5 + $0x98] sm:$0xf]  ;;  %v2622_v55 = vor.u32 %v3646_v45, %v2621_v44 }
  0x36   :  { %526 = vmatpush.bf16.msrb.mxu1 %v2686_v4  ;;  %v3610_v54 = vld [vmem:[#allocation5 + $0xdc] sm:$0xf0]  ;;  %v3695_v56 = vld [vmem:[#allocation5 + $0x404] sm:$0xf]  ;;  %v2610_v57 = vor.u32 %v3640_v46, %v2607_v47  ;;  %v2823_v60 = vld [vmem:[#allocation5 + $0x448] sm:$0xf0] }
  0x37   :  { %539 = vmatpush.bf16.msrb.mxu2 %v2562_v52  ;;  %v2463_v52 = vld [vmem:[#allocation5 + $0x50] sm:$0xf0]  ;;  %v3642_v59 = vld [vmem:[#allocation5 + $0x55c] sm:$0xf0]  ;;  %v3636_v61 = vld [vmem:[#allocation5 + $0x48c] sm:$0xf]  ;;  %v2478_v1 = vor.u32 %v3610_v54, %v2477_v53  ;;  %v2826_v8 = vor.u32 %v3695_v56, %v2823_v60 }
  0x38   :  { %552 = vmatpush.bf16.msrb.mxu3 %v2690_v58  ;;  %v2605_v58 = vld [vmem:[#allocation5 + $0x518] sm:$0xf]  ;;  %v2591_v62 = vld [vmem:[#allocation5 + $0x4d0] sm:$0xf0]  ;;  %v3727_v63 = vld [vmem:[#allocation5 + $0x884] sm:$0xf]  ;;  %v2466_v2 = vor.u32 %v3604_v49, %v2463_v52 }
  0x39   :  { %514 = vmatpush.bf16.msrb.mxu0 %v2542_v11  ;;  %v3691_v3 = vld [vmem:[#allocation5 + $0x374] sm:$0xf]  ;;  %v2461_v4 = vld [vmem:[#allocation5 + $0x8] sm:$0xf]  ;;  %v3606_v5 = vld [vmem:[#allocation5 + $0x4c] sm:$0xf0]  ;;  %v2606_v7 = vor.u32 %v3642_v59, %v2605_v58  ;;  %v2594_v9 = vor.u32 %v3636_v61, %v2591_v62 }
  0x3a   :  { %527 = vmatpush.bf16.msrb.mxu1 %v2670_v16  ;;  %v3697_v10 = vld [vmem:[#allocation5 + $0x444] sm:$0xf0]  ;;  %v2807_v13 = vld [vmem:[#allocation5 + $0x3b8] sm:$0xf0]  ;;  %v2949_v15 = vld [vmem:[#allocation5 + $0x880] sm:$0xf]  ;;  %v2462_v19 = vor.u32 %v3606_v5, %v2461_v4 }
  0x3b   :  { %540 = vmatpush.bf16.msrb.mxu2 %v2546_v0  ;;  %v2951_v0 = vld [vmem:[#allocation5 + $0x8c8] sm:$0xf0]  ;;  %v2589_v11 = vld [vmem:[#allocation5 + $0x488] sm:$0xf]  ;;  %v3723_v17 = vld [vmem:[#allocation5 + $0x7f4] sm:$0xf]  ;;  %v2810_v22 = vor.u32 %v3691_v3, %v2807_v13 }
  0x3c   :  { %553 = vmatpush.bf16.msrb.mxu3 %v2674_v6  ;;  %v2821_v6 = vld [vmem:[#allocation5 + $0x400] sm:$0xf]  ;;  %v2954_v14 = vor.u32 %v3727_v63, %v2951_v0  ;;  %v3729_v16 = vld [vmem:[#allocation5 + $0x8c4] sm:$0xf0]  ;;  %v3693_v25 = vld [vmem:[#allocation5 + $0x3b4] sm:$0xf0] }
  0x3d   :  { %515 = vmatpush.bf16.msrb.mxu0 %v2526_v23  ;;  %v2822_v20 = vor.u32 %v3697_v10, %v2821_v6  ;;  %v3687_v23 = vld [vmem:[#allocation5 + $0x2e4] sm:$0xf]  ;;  %v2950_v26 = vor.u32 %v3729_v16, %v2949_v15  ;;  %v2791_v27 = vld [vmem:[#allocation5 + $0x328] sm:$0xf0]  ;;  %v2933_v29 = vld [vmem:[#allocation5 + $0x7f0] sm:$0xf] }
  0x3e   :  { %528 = vmatpush.bf16.msrb.mxu1 %v2654_v28  ;;  %v3719_v31 = vld [vmem:[#allocation5 + $0x764] sm:$0xf]  ;;  %v2919_v32 = vld [vmem:[#allocation5 + $0x7a8] sm:$0xf0]  ;;  %v2794_v34 = vor.u32 %v3687_v23, %v2791_v27  ;;  %v3689_v37 = vld [vmem:[#allocation5 + $0x324] sm:$0xf0] }
  0x3f   :  { %541 = vmatpush.bf16.msrb.mxu2 %v2530_v12  ;;  %v3638_v12 = vld [vmem:[#allocation5 + $0x4cc] sm:$0xf0]  ;;  %v2775_v39 = vld [vmem:[#allocation5 + $0x298] sm:$0xf0]  ;;  %v2917_v41 = vld [vmem:[#allocation5 + $0x760] sm:$0xf] }
  0x40   :  { %554 = vmatpush.bf16.msrb.mxu3 %v2658_v18  ;;  %v2935_v18 = vld [vmem:[#allocation5 + $0x838] sm:$0xf0]  ;;  %v2590_v21 = vor.u32 %v3638_v12, %v2589_v11  ;;  %v3715_v44 = vld [vmem:[#allocation5 + $0x6d4] sm:$0xf]  ;;  %v3679_v49 = vld [vmem:[#allocation5 + $0x1c4] sm:$0xf] }
  0x41   :  { %516 = vmatpush.bf16.msrb.mxu0 %v2510_v35  ;;  %v2938_v28 = vor.u32 %v3723_v17, %v2935_v18  ;;  %v3683_v35 = vld [vmem:[#allocation5 + $0x254] sm:$0xf]  ;;  %v2903_v45 = vld [vmem:[#allocation5 + $0x718] sm:$0xf0]  ;;  %v2759_v53 = vld [vmem:[#allocation5 + $0x208] sm:$0xf0] }
  0x42   :  { %529 = vmatpush.bf16.msrb.mxu1 %v2638_v40  ;;  %v2922_v40 = vor.u32 %v3719_v31, %v2919_v32  ;;  %v2778_v47 = vor.u32 %v3683_v35, %v2775_v39  ;;  %v2906_v54 = vor.u32 %v3715_v44, %v2903_v45  ;;  %v3711_v56 = vld [vmem:[#allocation5 + $0x644] sm:$0xf]  ;;  %v3675_v59 = vld [vmem:[#allocation5 + $0x134] sm:$0xf]  ;;  %v2757_v60 = vld [vmem:[#allocation5 + $0x1c0] sm:$0xf] }
  0x43   :  { %542 = vmatpush.bf16.msrb.mxu2 %v2514_v24  ;;  %v2805_v24 = vld [vmem:[#allocation5 + $0x370] sm:$0xf]  ;;  %v3681_v61 = vld [vmem:[#allocation5 + $0x204] sm:$0xf0]  ;;  %v2743_v63 = vld [vmem:[#allocation5 + $0x178] sm:$0xf0] }
  0x44   :  { %555 = vmatpush.bf16.msrb.mxu3 %v2642_v30  ;;  %v3725_v30 = vld [vmem:[#allocation5 + $0x834] sm:$0xf0]  ;;  %v2806_v33 = vor.u32 %v3693_v25, %v2805_v24  ;;  %v3707_v3 = vld [vmem:[#allocation5 + $0x5b4] sm:$0xf]  ;;  %v2871_v4 = vld [vmem:[#allocation5 + $0x5f8] sm:$0xf0]  ;;  %v2758_v5 = vor.u32 %v3681_v61, %v2757_v60  ;;  %v2746_v6 = vor.u32 %v3675_v59, %v2743_v63 }
  0x45   :  { %517 = vmatpush.bf16.msrb.mxu0 %v2494_v50  ;;  %v2934_v38 = vor.u32 %v3725_v30, %v2933_v29  ;;  %v2773_v50 = vld [vmem:[#allocation5 + $0x250] sm:$0xf]  ;;  %v2727_v11 = vld [vmem:[#allocation5 + $0xe8] sm:$0xf0]  ;;  %v2874_v12 = vor.u32 %v3707_v3, %v2871_v4  ;;  %v3703_v15 = vld [vmem:[#allocation5 + $0x524] sm:$0xf] }
  0x46   :  { %530 = vmatpush.bf16.msrb.mxu1 %v2622_v55  ;;  %v2901_v55 = vld [vmem:[#allocation5 + $0x6d0] sm:$0xf]  ;;  %v2855_v16 = vld [vmem:[#allocation5 + $0x568] sm:$0xf0]  ;;  %v3667_v17 = vld [vmem:[#allocation5 + $0x14] sm:$0xf] }
  0x47   :  { %543 = vmatpush.bf16.msrb.mxu2 %v2498_v36  ;;  %v2789_v36 = vld [vmem:[#allocation5 + $0x2e0] sm:$0xf]  ;;  %v2869_v13 = vld [vmem:[#allocation5 + $0x5b0] sm:$0xf]  ;;  %v3696_v24 = vld [vmem:[#allocation5 + $0x40c] sm:$0xf]  ;;  %v2858_v25 = vor.u32 %v3703_v15, %v2855_v16 }
  0x48   :  { %556 = vmatpush.bf16.msrb.mxu3 %v2626_v42  ;;  %v3721_v42 = vld [vmem:[#allocation5 + $0x7a4] sm:$0xf0]  ;;  %v2790_v46 = vor.u32 %v3689_v37, %v2789_v36  ;;  %v3699_v29 = vld [vmem:[#allocation5 + $0x494] sm:$0xf]  ;;  %v2839_v30 = vld [vmem:[#allocation5 + $0x4d8] sm:$0xf0] }
  0x49   :  { %518 = vmatpush.bf16.msrb.mxu0 %v2478_v1  ;;  %v2918_v52 = vor.u32 %v3721_v42, %v2917_v41  ;;  %v2885_v1 = vld [vmem:[#allocation5 + $0x640] sm:$0xf]  ;;  %v3705_v27 = vld [vmem:[#allocation5 + $0x564] sm:$0xf0]  ;;  %v3728_v31 = vld [vmem:[#allocation5 + $0x88c] sm:$0xf]  ;;  %v2842_v42 = vor.u32 %v3699_v29, %v2839_v30 }
  0x4a   :  { %531 = vmatpush.bf16.msrb.mxu1 %v2606_v7  ;;  %v3671_v7 = vld [vmem:[#allocation5 + $0xa4] sm:$0xf]  ;;  %v2959_v32 = vld [vmem:[#allocation5 + $0x8d0] sm:$0xf0]  ;;  %v3692_v36 = vld [vmem:[#allocation5 + $0x37c] sm:$0xf] }
  0x4b   :  { %544 = vmatpush.bf16.msrb.mxu2 %v2482_v51  ;;  %v3685_v51 = vld [vmem:[#allocation5 + $0x294] sm:$0xf0]  ;;  %v3698_v39 = vld [vmem:[#allocation5 + $0x44c] sm:$0xf0]  ;;  %v3694_v60 = vld [vmem:[#allocation5 + $0x3bc] sm:$0xf0] }
  0x4c   :  { %557 = vmatpush.bf16.msrb.mxu3 %v2610_v57  ;;  %v2887_v57 = vld [vmem:[#allocation5 + $0x688] sm:$0xf0]  ;;  %v2774_v58 = vor.u32 %v3685_v51, %v2773_v50  ;;  %v3669_v37 = vld [vmem:[#allocation5 + $0x54] sm:$0xf0]  ;;  %v2837_v44 = vld [vmem:[#allocation5 + $0x490] sm:$0xf] }
  0x4d   :  { %519 = vmatpush.bf16.msrb.mxu0 %v2462_v19  ;;  %v2890_v0 = vor.u32 %v3711_v56, %v2887_v57  ;;  %v2730_v19 = vor.u32 %v3671_v7, %v2727_v11  ;;  %v3701_v45 = vld [vmem:[#allocation5 + $0x4d4] sm:$0xf0]  ;;  %v2957_v50 = vld [vmem:[#allocation5 + $0x888] sm:$0xf]  ;;  %v3730_v51 = vld [vmem:[#allocation5 + $0x8cc] sm:$0xf0] }
  0x4e   :  { %532 = vmatpush.bf16.msrb.mxu1 %v2590_v21  ;;  %v2725_v21 = vld [vmem:[#allocation5 + $0xa0] sm:$0xf]  ;;  %v2838_v56 = vor.u32 %v3701_v45, %v2837_v44  ;;  %v2813_v59 = vld [vmem:[#allocation5 + $0x378] sm:$0xf]  ;;  %v2958_v61 = vor.u32 %v3730_v51, %v2957_v50  ;;  %v3720_v3 = vld [vmem:[#allocation5 + $0x76c] sm:$0xf] }
  0x4f   :  { %545 = vmatpush.bf16.msrb.mxu2 %v2466_v2  ;;  %v3713_v2 = vld [vmem:[#allocation5 + $0x684] sm:$0xf0]  ;;  %v2927_v4 = vld [vmem:[#allocation5 + $0x7b0] sm:$0xf0]  ;;  %v3722_v15 = vld [vmem:[#allocation5 + $0x7ac] sm:$0xf0] }
  0x50   :  { %558 = vmatpush.bf16.msrb.mxu3 %v2594_v9  ;;  %520 = vmatmul.bf16.vlgmr.msrb.gmra.mxu0 %v4034_v43  ;;  %v3677_v9 = vld [vmem:[#allocation5 + $0x174] sm:$0xf0]  ;;  %v2886_v10 = vor.u32 %v3713_v2, %v2885_v1  ;;  %v3726_v1 = vld [vmem:[#allocation5 + $0x83c] sm:$0xf0]  ;;  %v3716_v16 = vld [vmem:[#allocation5 + $0x6dc] sm:$0xf] }
  0x51   :  { %955 = vmatpush.bf16.msra.mxu0 %v2822_v20  ;;  %533 = vmatmul.bf16.vlgmr.msrb.gmra.mxu1 %v4036_v48  ;;  %v2711_v20 = vld [vmem:[#allocation5 + $0x58] sm:$0xf0]  ;;  %v2895_v29 = vld [vmem:[#allocation5 + $0x690] sm:$0xf0]  ;;  %v3672_v45 = vld [vmem:[#allocation5 + $0xac] sm:$0xf] }
  0x52   :  { %546 = vmatmul.bf16.vlgmr.msrb.gmra.mxu2 %v4034_v43  ;;  %968 = vmatpush.bf16.msra.mxu1 %v2950_v26  ;;  %v3717_v43 = vld [vmem:[#allocation5 + $0x714] sm:$0xf0]  ;;  %v2853_v26 = vld [vmem:[#allocation5 + $0x520] sm:$0xf]  ;;  %v2714_v35 = vor.u32 %v3667_v17, %v2711_v20  ;;  %v2911_v17 = vld [vmem:[#allocation5 + $0x720] sm:$0xf0] }
  0x53   :  { %981 = vmatpush.bf16.msra.mxu2 %v2826_v8  ;;  %559 = vmatmul.bf16.vlgmr.msrb.gmra.mxu3 %v4036_v48  ;;  %v2762_v48 = vor.u32 %v3679_v49, %v2759_v53  ;;  %v2902_v62 = vor.u32 %v3717_v43, %v2901_v55  ;;  %v2741_v8 = vld [vmem:[#allocation5 + $0x130] sm:$0xf]  ;;  %v2962_v49 = vor.u32 %v3728_v31, %v2959_v32  ;;  %v3724_v53 = vld [vmem:[#allocation5 + $0x7fc] sm:$0xf]  ;;  %v3680_v20 = vld [vmem:[#allocation5 + $0x1cc] sm:$0xf] }
  0x54   :  { %994 = vmatpush.bf16.msra.mxu3 %v2954_v14  ;;  %v3709_v14 = vld [vmem:[#allocation5 + $0x5f4] sm:$0xf0]  ;;  %v2742_v18 = vor.u32 %v3677_v9, %v2741_v8  ;;  %v3684_v8 = vld [vmem:[#allocation5 + $0x25c] sm:$0xf]  ;;  %v2797_v9 = vld [vmem:[#allocation5 + $0x2e8] sm:$0xf] }
  0x55   :  { %956 = vmatpush.bf16.msra.mxu0 %v2806_v33  ;;  %v2870_v23 = vor.u32 %v3709_v14, %v2869_v13  ;;  %v2930_v13 = vor.u32 %v3720_v3, %v2927_v4  ;;  %v2925_v14 = vld [vmem:[#allocation5 + $0x768] sm:$0xf]  ;;  %v3676_v32 = vld [vmem:[#allocation5 + $0x13c] sm:$0xf]  ;;  %v2735_v50 = vld [vmem:[#allocation5 + $0xf0] sm:$0xf0] }
  0x56   :  { %969 = vmatpush.bf16.msra.mxu1 %v2934_v38  ;;  %v2829_v38 = vld [vmem:[#allocation5 + $0x408] sm:$0xf]  ;;  %v3700_v3 = vld [vmem:[#allocation5 + $0x49c] sm:$0xf]  ;;  %v2847_v4 = vld [vmem:[#allocation5 + $0x4e0] sm:$0xf0] }
  0x57   :  { %982 = vmatpush.bf16.msra.mxu2 %v2810_v22  ;;  %v3673_v22 = vld [vmem:[#allocation5 + $0xe4] sm:$0xf0]  ;;  %v2830_v43 = vor.u32 %v3698_v39, %v2829_v38  ;;  %v3714_v39 = vld [vmem:[#allocation5 + $0x68c] sm:$0xf0]  ;;  %s2438_s2 = sshll.u32 %s4004_s0, 4  ;;  %s2440_s30 = sshll.u32 %s4091_s3, 4  ;;  %s2439_s2 = int_to_ptr.vmem [resolvable:$true] %s2438_s2  ;;  %s2441_s30 = int_to_ptr.hbm [resolvable:$true] %s2440_s30 }
  0x58   :  { %995 = vmatpush.bf16.msra.mxu3 %v2938_v28  ;;  %v2831_v28 = vld [vmem:[#allocation5 + $0x450] sm:$0xf0]  ;;  %v2726_v33 = vor.u32 %v3673_v22, %v2725_v21  ;;  %v2781_v21 = vld [vmem:[#allocation5 + $0x258] sm:$0xf]  ;;  %v3686_v22 = vld [vmem:[#allocation5 + $0x29c] sm:$0xf0] }
  0x59   :  { %957 = vmatpush.bf16.msra.mxu0 %v2790_v46  ;;  %v2834_v41 = vor.u32 %v3696_v24, %v2831_v28  ;;  %v59_v46 = vld [vmem:[#allocation2 + $0x8] sm:$0xff]  ;;  %v2767_v24 = vld [vmem:[#allocation5 + $0x210] sm:$0xf0]  ;;  %v3712_v28 = vld [vmem:[#allocation5 + $0x64c] sm:$0xf]  ;;  %v2782_v30 = vor.u32 %v3686_v22, %v2781_v21 }
  0x5a   :  { %970 = vmatpush.bf16.msra.mxu1 %v2918_v52  ;;  %v629_v52 = vunpack.c.l.b16 %v59_v46  ;;  %v630_v2 = vunpack.c.h.b16 %v59_v46  ;;  %v2770_v31 = vor.u32 %v3680_v20, %v2767_v24  ;;  %v2893_v38 = vld [vmem:[#allocation5 + $0x648] sm:$0xf]  ;;  %v2749_v46 = vld [vmem:[#allocation5 + $0x138] sm:$0xf]  ;;  %v3015_v20 = vld [vmem:[#allocation5 + $0x3c8] sm:$0xf0] }
  0x5b   :  { %983 = vmatpush.bf16.msra.mxu2 %v2794_v34  ;;  %v2709_v34 = vld [vmem:[#allocation5 + $0x10] sm:$0xf]  ;;  %v3775_v24 = vld [vmem:[#allocation5 + $0x804] sm:$0xf] }
  0x5c   :  { %996 = vmatpush.bf16.msra.mxu3 %v2922_v40  ;;  %v2854_v40 = vor.u32 %v3705_v27, %v2853_v26  ;;  %v2710_v55 = vor.u32 %v3669_v37, %v2709_v34  ;;  %v4046_v57 = vpack.c.b16 %v629_v52, %v629_v52  ;;  %v2909_v26 = vld [vmem:[#allocation5 + $0x6d8] sm:$0xf]  ;;  %v3718_v27 = vld [vmem:[#allocation5 + $0x71c] sm:$0xf0]  ;;  %v3682_v34 = vld [vmem:[#allocation5 + $0x20c] sm:$0xf0]  ;;  %v2898_v37 = vor.u32 %v3712_v28, %v2895_v29 }
  0x5d   :  { %958 = vmatpush.bf16.msra.mxu0 %v2774_v58  ;;  %v2877_v52 = vld [vmem:[#allocation5 + $0x5b8] sm:$0xf]  ;;  %v3085_v22 = vld [vmem:[#allocation5 + $0x890] sm:$0xf] }
  0x5e   :  { %971 = vmatpush.bf16.msra.mxu1 %v2902_v62  ;;  %v2799_v62 = vld [vmem:[#allocation5 + $0x330] sm:$0xf0] }
  0x5f   :  { %984 = vmatpush.bf16.msra.mxu2 %v2778_v47  ;;  %v2815_v47 = vld [vmem:[#allocation5 + $0x3c0] sm:$0xf0] }
  0x60   :  { %997 = vmatpush.bf16.msra.mxu3 %v2906_v54  ;;  %v2943_v54 = vld [vmem:[#allocation5 + $0x840] sm:$0xf0]  ;;  %v2818_v58 = vor.u32 %v3692_v36, %v2815_v47  ;;  %v3678_v47 = vld [vmem:[#allocation5 + $0x17c] sm:$0xf0] }
  0x61   :  { %959 = vmatpush.bf16.msra.mxu0 %v2758_v5  ;;  %v2946_v63 = vor.u32 %v3724_v53, %v2943_v54  ;;  %v2814_v5 = vor.u32 %v3694_v60, %v2813_v59  ;;  %v2751_v36 = vld [vmem:[#allocation5 + $0x180] sm:$0xf0]  ;;  %v3710_v53 = vld [vmem:[#allocation5 + $0x5fc] sm:$0xf0]  ;;  %v3704_v54 = vld [vmem:[#allocation5 + $0x52c] sm:$0xf] }
  0x62   :  { %972 = vmatpush.bf16.msra.mxu1 %v2886_v10  ;;  %v3690_v10 = vld [vmem:[#allocation5 + $0x32c] sm:$0xf0]  ;;  %v2754_v44 = vor.u32 %v3676_v32, %v2751_v36  ;;  %v2733_v59 = vld [vmem:[#allocation5 + $0xa8] sm:$0xf]  ;;  %v3077_v36 = vld [vmem:[#allocation5 + $0x800] sm:$0xf] }
  0x63   :  { %985 = vmatpush.bf16.msra.mxu2 %v2762_v48  ;;  %v3688_v48 = vld [vmem:[#allocation5 + $0x2ec] sm:$0xf]  ;;  %v3674_v60 = vld [vmem:[#allocation5 + $0xec] sm:$0xf0]  ;;  %v3760_v32 = vld [vmem:[#allocation5 + $0x3c4] sm:$0xf0] }
  0x64   :  { %998 = vmatpush.bf16.msra.mxu3 %v2890_v0  ;;  %v2941_v0 = vld [vmem:[#allocation5 + $0x7f8] sm:$0xf]  ;;  %v2802_v7 = vor.u32 %v3688_v48, %v2799_v62  ;;  %v2719_v48 = vld [vmem:[#allocation5 + $0x60] sm:$0xf0]  ;;  %v3761_v62 = vld [vmem:[#allocation5 + $0x414] sm:$0xf] }
  0x65   :  { %960 = vmatpush.bf16.msra.mxu0 %v2742_v18  ;;  %v2942_v11 = vor.u32 %v3726_v1, %v2941_v0  ;;  %v2798_v18 = vor.u32 %v3690_v10, %v2797_v9  ;;  %v2861_v0 = vld [vmem:[#allocation5 + $0x528] sm:$0xf]  ;;  %v3706_v1 = vld [vmem:[#allocation5 + $0x56c] sm:$0xf0]  ;;  %v3759_v10 = vld [vmem:[#allocation5 + $0x384] sm:$0xf] }
  0x66   :  { %973 = vmatpush.bf16.msra.mxu1 %v2870_v23  ;;  %v2926_v23 = vor.u32 %v3722_v15, %v2925_v14  ;;  %v2862_v14 = vor.u32 %v3706_v1, %v2861_v0  ;;  %v3018_v29 = vor.u32 %v3759_v10, %v3015_v20  ;;  %v3751_v1 = vld [vmem:[#allocation5 + $0x144] sm:$0xf]  ;;  %v3045_v20 = vld [vmem:[#allocation5 + $0x5c0] sm:$0xf] }
  0x67   :  { %986 = vmatpush.bf16.msra.mxu2 %v2746_v6  ;;  %v4049_v6 = vpack.c.b16 %v630_v2, %v630_v2  ;;  %v3023_v2 = vld [vmem:[#allocation5 + $0x458] sm:$0xf0]  ;;  %v3767_v10 = vld [vmem:[#allocation5 + $0x5c4] sm:$0xf] }
  0x68   :  { %999 = vmatpush.bf16.msra.mxu3 %v2874_v12  ;;  %v2783_v12 = vld [vmem:[#allocation5 + $0x2a0] sm:$0xf0]  ;;  %v3026_v15 = vor.u32 %v3761_v62, %v3023_v2  ;;  %v3769_v62 = vld [vmem:[#allocation5 + $0x654] sm:$0xf]  ;;  %v2989_v2 = vld [vmem:[#allocation5 + $0x1d0] sm:$0xf] }
  0x69   :  { %961 = vmatpush.bf16.msra.mxu0 %v2726_v33  ;;  %v2765_v33 = vld [vmem:[#allocation5 + $0x1c8] sm:$0xf] }
  0x6a   :  { %974 = vmatpush.bf16.msra.mxu1 %v2854_v40  ;;  %v3708_v40 = vld [vmem:[#allocation5 + $0x5bc] sm:$0xf] }
  0x6b   :  { %987 = vmatpush.bf16.msra.mxu2 %v2730_v19  ;;  %v2786_v19 = vor.u32 %v3684_v8, %v2783_v12  ;;  %v2734_v8 = vor.u32 %v3674_v60, %v2733_v59  ;;  %v3670_v12 = vld [vmem:[#allocation5 + $0x5c] sm:$0xf0]  ;;  %v2991_v59 = vld [vmem:[#allocation5 + $0x218] sm:$0xf0] }
  0x6c   :  { %1000 = vmatpush.bf16.msra.mxu3 %v2858_v25  ;;  %v2914_v25 = vor.u32 %v3716_v16, %v2911_v17  ;;  %v2850_v16 = vor.u32 %v3700_v3, %v2847_v4  ;;  %v3762_v17 = vld [vmem:[#allocation5 + $0x454] sm:$0xf0] }
  0x6d   :  { %962 = vmatpush.bf16.msra.mxu0 %v2710_v55  ;;  %v2863_v55 = vld [vmem:[#allocation5 + $0x570] sm:$0xf0]  ;;  %v3754_v3 = vld [vmem:[#allocation5 + $0x214] sm:$0xf0] }
  0x6e   :  { %975 = vmatpush.bf16.msra.mxu1 %v2838_v56  ;;  %v2750_v56 = vor.u32 %v3678_v47, %v2749_v46  ;;  %v2999_v47 = vld [vmem:[#allocation5 + $0x2a8] sm:$0xf0] }
  0x6f   :  { %988 = vmatpush.bf16.msra.mxu2 %v2714_v35  ;;  %v2910_v35 = vor.u32 %v3718_v27, %v2909_v26 }
  0x70   :  { %1001 = vmatpush.bf16.msra.mxu3 %v2842_v42  ;;  %963 = vmatmul.bf16.vlgmr.msra.gmra.mxu0 %v4046_v57  ;;  %v2766_v42 = vor.u32 %v3682_v34, %v2765_v33  ;;  %v3007_v34 = vld [vmem:[#allocation5 + $0x338] sm:$0xf0] }
  0x71   :  { %1007 = vmatpush.bf16.msrb.mxu0 %v2830_v43  ;;  %976 = vmatmul.bf16.vlgmr.msra.gmra.mxu1 %v4049_v6  ;;  %v3668_v43 = vld [vmem:[#allocation5 + $0x1c] sm:$0xf] }
  0x72   :  { %989 = vmatmul.bf16.vlgmr.msra.gmra.mxu2 %v4046_v57  ;;  %1020 = vmatpush.bf16.msrb.mxu1 %v2958_v61  ;;  %v2878_v61 = vor.u32 %v3710_v53, %v2877_v52  ;;  %v2722_v9 = vor.u32 %v3668_v43, %v2719_v48  ;;  %v3771_v52 = vld [vmem:[#allocation5 + $0x6e4] sm:$0xf]  ;;  %v3063_v53 = vld [vmem:[#allocation5 + $0x728] sm:$0xf0]  ;;  %v3753_v43 = vld [vmem:[#allocation5 + $0x1d4] sm:$0xf] }
  0x73   :  { %1033 = vmatpush.bf16.msrb.mxu2 %v2834_v41  ;;  %1002 = vmatmul.bf16.vlgmr.msra.gmra.mxu3 %v4049_v6  ;;  %v2879_v41 = vld [vmem:[#allocation5 + $0x600] sm:$0xf0]  ;;  %v3066_v60 = vor.u32 %v3771_v52, %v3063_v53  ;;  %v3737_v52 = vld [vmem:[#allocation5 + $0x3dc] sm:$0xf0] }
  0x74   :  { %1046 = vmatpush.bf16.msrb.mxu3 %v2962_v49  ;;  %v2894_v49 = vor.u32 %v3714_v39, %v2893_v38  ;;  %v2882_v51 = vor.u32 %v3708_v40, %v2879_v41  ;;  %v3773_v38 = vld [vmem:[#allocation5 + $0x774] sm:$0xf]  ;;  %v3071_v39 = vld [vmem:[#allocation5 + $0x7b8] sm:$0xf0] }
  0x75   :  { %1008 = vmatpush.bf16.msrb.mxu0 %v2814_v5  ;;  %v3777_v5 = vld [vmem:[#allocation5 + $0x894] sm:$0xf] }
  0x76   :  { %1021 = vmatpush.bf16.msrb.mxu1 %v2942_v11  ;;  %v2717_v11 = vld [vmem:[#allocation5 + $0x18] sm:$0xf] }
  0x77   :  { %1034 = vmatpush.bf16.msrb.mxu2 %v2818_v58  ;;  %v2738_v58 = vor.u32 %v3672_v45, %v2735_v50  ;;  %v2718_v26 = vor.u32 %v3670_v12, %v2717_v11  ;;  %v3758_v45 = vld [vmem:[#allocation5 + $0x334] sm:$0xf0]  ;;  %v3069_v50 = vld [vmem:[#allocation5 + $0x770] sm:$0xf]  ;;  %v3047_v11 = vld [vmem:[#allocation5 + $0x608] sm:$0xf0]  ;;  %v2990_v12 = vor.u32 %v3754_v3, %v2989_v2 }
  0x78   :  { %1047 = vmatpush.bf16.msrb.mxu3 %v2946_v63  ;;  %v2866_v63 = vor.u32 %v3704_v54, %v2863_v55  ;;  %v3743_v2 = vld [vmem:[#allocation5 + $0x73c] sm:$0xf0] }
  0x79   :  { %1009 = vmatpush.bf16.msrb.mxu0 %v2798_v18  ;;  %v2845_v18 = vld [vmem:[#allocation5 + $0x498] sm:$0xf]  ;;  %v60_v3 = vld [vmem:[#allocation7] sm:$0xff] }
  0x7a   :  { %1022 = vmatpush.bf16.msrb.mxu1 %v2926_v23  ;;  %v3778_v23 = vld [vmem:[#allocation5 + $0x8d4] sm:$0xf0] }
  0x7b   :  { %1035 = vmatpush.bf16.msrb.mxu2 %v2802_v7  ;;  %v3087_v7 = vld [vmem:[#allocation5 + $0x8d8] sm:$0xf0]  ;;  %v3086_v33 = vor.u32 %v3778_v23, %v3085_v22  ;;  %v3765_v22 = vld [vmem:[#allocation5 + $0x534] sm:$0xf] }
  0x7c   :  { %1048 = vmatpush.bf16.msrb.mxu3 %v2930_v13  ;;  %v3021_v13 = vld [vmem:[#allocation5 + $0x410] sm:$0xf]  ;;  %v3090_v21 = vor.u32 %v3777_v5, %v3087_v7  ;;  %v2983_v5 = vld [vmem:[#allocation5 + $0x188] sm:$0xf0]  ;;  %v3039_v23 = vld [vmem:[#allocation5 + $0x578] sm:$0xf0] }
  0x7d   :  { %1010 = vmatpush.bf16.msrb.mxu0 %v2782_v30  ;;  %v3022_v27 = vor.u32 %v3762_v17, %v3021_v13  ;;  %v3757_v30 = vld [vmem:[#allocation5 + $0x2f4] sm:$0xf]  ;;  %v2986_v13 = vor.u32 %v3751_v1, %v2983_v5  ;;  %v3205_v1 = vld [vmem:[#allocation5 + $0x6f8] sm:$0xf]  ;;  %v3169_v5 = vld [vmem:[#allocation5 + $0x1e8] sm:$0xf] }
  0x7e   :  { %1023 = vmatpush.bf16.msrb.mxu1 %v2910_v35  ;;  %v3010_v41 = vor.u32 %v3757_v30, %v3007_v34  ;;  %v3766_v34 = vld [vmem:[#allocation5 + $0x574] sm:$0xf0] }
  0x7f   :  { %1036 = vmatpush.bf16.msrb.mxu2 %v2786_v19  ;;  %v3702_v19 = vld [vmem:[#allocation5 + $0x4dc] sm:$0xf0] }
  0x80   :  { %1049 = vmatpush.bf16.msrb.mxu3 %v2914_v25  ;;  %v3079_v25 = vld [vmem:[#allocation5 + $0x848] sm:$0xf0]  ;;  %v2846_v28 = vor.u32 %v3702_v19, %v2845_v18  ;;  %v2975_v18 = vld [vmem:[#allocation5 + $0xf8] sm:$0xf0]  ;;  %v3050_v19 = vor.u32 %v3767_v10, %v3047_v11  ;;  %v3201_v10 = vld [vmem:[#allocation5 + $0x668] sm:$0xf] }
  0x81   :  { %1011 = vmatpush.bf16.msrb.mxu0 %v2766_v42  ;;  %v3082_v35 = vor.u32 %v3775_v24, %v3079_v25  ;;  %v3755_v42 = vld [vmem:[#allocation5 + $0x264] sm:$0xf]  ;;  %v3742_v11 = vld [vmem:[#allocation5 + $0x6ac] sm:$0xf0] }
  0x82   :  { %1024 = vmatpush.bf16.msrb.mxu1 %v2894_v49  ;;  %v3074_v49 = vor.u32 %v3773_v38, %v3071_v39  ;;  %v3002_v55 = vor.u32 %v3755_v42, %v2999_v47  ;;  %v3747_v24 = vld [vmem:[#allocation5 + $0x24] sm:$0xf]  ;;  %v3217_v38 = vld [vmem:[#allocation5 + $0x8a8] sm:$0xf]  ;;  %v3746_v39 = vld [vmem:[#allocation5 + $0x8ec] sm:$0xf0] }
  0x83   :  { %1037 = vmatpush.bf16.msrb.mxu2 %v2770_v31  ;;  %v3013_v31 = vld [vmem:[#allocation5 + $0x380] sm:$0xf]  ;;  %v3218_v53 = vor.u32 %v3746_v39, %v3217_v38 }
  0x84   :  { %1050 = vmatpush.bf16.msrb.mxu3 %v2898_v37  ;;  %v3776_v37 = vld [vmem:[#allocation5 + $0x844] sm:$0xf0]  ;;  %v3014_v40 = vor.u32 %v3760_v32, %v3013_v31  ;;  %v3042_v32 = vor.u32 %v3765_v22, %v3039_v23  ;;  %v2965_v42 = vld [vmem:[#allocation5 + $0x20] sm:$0xf] }
  0x85   :  { %1012 = vmatpush.bf16.msrb.mxu0 %v2750_v56  ;;  %v3078_v46 = vor.u32 %v3776_v37, %v3077_v36  ;;  %v2997_v56 = vld [vmem:[#allocation5 + $0x260] sm:$0xf]  ;;  %v3185_v31 = vld [vmem:[#allocation5 + $0x428] sm:$0xf]  ;;  %v3763_v36 = vld [vmem:[#allocation5 + $0x4a4] sm:$0xf] }
  0x86   :  { %1025 = vmatpush.bf16.msrb.mxu1 %v2878_v61  ;;  %v3061_v61 = vld [vmem:[#allocation5 + $0x6e0] sm:$0xf]  ;;  %v3031_v37 = vld [vmem:[#allocation5 + $0x4e8] sm:$0xf0] }
  0x87   :  { %1038 = vmatpush.bf16.msrb.mxu2 %v2754_v44  ;;  %v3005_v44 = vld [vmem:[#allocation5 + $0x2f0] sm:$0xf]  ;;  %v3034_v47 = vor.u32 %v3763_v36, %v3031_v37  ;;  %v61_v22 = vld [vmem:[#allocation7 + $0x8] sm:$0xff]  ;;  %v3157_v37 = vld [vmem:[#allocation5 + $0x38] sm:$0xf] }
  0x88   :  { %1051 = vmatpush.bf16.msrb.mxu3 %v2882_v51  ;;  %v3774_v51 = vld [vmem:[#allocation5 + $0x7b4] sm:$0xf0]  ;;  %v3006_v54 = vor.u32 %v3758_v45, %v3005_v44  ;;  %v3748_v44 = vld [vmem:[#allocation5 + $0x64] sm:$0xf0]  ;;  %v3731_v38 = vld [vmem:[#allocation5 + $0x7c] sm:$0xf0] }
  0x89   :  { %1013 = vmatpush.bf16.msrb.mxu0 %v2734_v8  ;;  %v3070_v48 = vor.u32 %v3774_v51, %v3069_v50  ;;  %v3053_v8 = vld [vmem:[#allocation5 + $0x650] sm:$0xf]  ;;  %v3764_v50 = vld [vmem:[#allocation5 + $0x4e4] sm:$0xf0]  ;;  %v3181_v51 = vld [vmem:[#allocation5 + $0x398] sm:$0xf] }
  0x8a   :  { %1026 = vmatpush.bf16.msrb.mxu1 %v2862_v14  ;;  %v3749_v14 = vld [vmem:[#allocation5 + $0xb4] sm:$0xf] }
  0x8b   :  { %1039 = vmatpush.bf16.msrb.mxu2 %v2738_v58  ;;  %v3756_v58 = vld [vmem:[#allocation5 + $0x2a4] sm:$0xf0] }
  0x8c   :  { %1052 = vmatpush.bf16.msrb.mxu3 %v2866_v63  ;;  %v3055_v63 = vld [vmem:[#allocation5 + $0x698] sm:$0xf0]  ;;  %v2998_v0 = vor.u32 %v3756_v58, %v2997_v56  ;;  %v3182_v58 = vor.u32 %v3737_v52, %v3181_v51  ;;  %v3121_v51 = vld [vmem:[#allocation5 + $0x42c] sm:$0xf]  ;;  %v3786_v52 = vld [vmem:[#allocation5 + $0x470] sm:$0xf0] }
  0x8d   :  { %1014 = vmatpush.bf16.msrb.mxu0 %v2718_v26  ;;  %v3058_v7 = vor.u32 %v3769_v62, %v3055_v63  ;;  %v2978_v26 = vor.u32 %v3749_v14, %v2975_v18  ;;  %v3173_v63 = vld [vmem:[#allocation5 + $0x278] sm:$0xf]  ;;  %v3202_v18 = vor.u32 %v3742_v11, %v3201_v10  ;;  %v3793_v10 = vld [vmem:[#allocation5 + $0x860] sm:$0xf0]  ;;  %v3109_v11 = vld [vmem:[#allocation5 + $0x27c] sm:$0xf] }
  0x8e   :  { %1027 = vmatpush.bf16.msrb.mxu1 %v2846_v28  ;;  %v2973_v28 = vld [vmem:[#allocation5 + $0xb0] sm:$0xf] }
  0x8f   :  { %1040 = vmatpush.bf16.msrb.mxu2 %v2722_v9  ;;  %v3770_v9 = vld [vmem:[#allocation5 + $0x694] sm:$0xf0] }
  0x90   :  { %1053 = vmatpush.bf16.msrb.mxu3 %v2850_v16  ;;  %1015 = vmatmul.bf16.vlgmr.msrb.gmra.mxu0 %v4046_v57  ;;  %v3752_v16 = vld [vmem:[#allocation5 + $0x184] sm:$0xf0]  ;;  %v3054_v17 = vor.u32 %v3770_v9, %v3053_v8  ;;  %v3206_v8 = vor.u32 %v3743_v2, %v3205_v1 }
  0x91   :  { %1287 = vmatpush.bf16.msra.mxu0 %v3022_v27  ;;  %1028 = vmatmul.bf16.vlgmr.msrb.gmra.mxu1 %v4049_v6  ;;  %v2967_v27 = vld [vmem:[#allocation5 + $0x68] sm:$0xf0] }
  0x92   :  { %1041 = vmatmul.bf16.vlgmr.msrb.gmra.mxu2 %v4046_v57  ;;  %1300 = vmatpush.bf16.msra.mxu1 %v3086_v33  ;;  %v3772_v57 = vld [vmem:[#allocation5 + $0x724] sm:$0xf0]  ;;  %v3037_v33 = vld [vmem:[#allocation5 + $0x530] sm:$0xf] }
  0x93   :  { %1313 = vmatpush.bf16.msra.mxu2 %v3026_v15  ;;  %1054 = vmatmul.bf16.vlgmr.msrb.gmra.mxu3 %v4049_v6  ;;  %v2994_v6 = vor.u32 %v3753_v43, %v2991_v59  ;;  %v3062_v4 = vor.u32 %v3772_v57, %v3061_v61  ;;  %v2981_v15 = vld [vmem:[#allocation5 + $0x140] sm:$0xf]  ;;  %v3038_v45 = vor.u32 %v3766_v34, %v3037_v33  ;;  %v3736_v59 = vld [vmem:[#allocation5 + $0x34c] sm:$0xf0]  ;;  %v3209_v61 = vld [vmem:[#allocation5 + $0x788] sm:$0xf] }
  0x94   :  { %1326 = vmatpush.bf16.msra.mxu3 %v3090_v21  ;;  %v3768_v21 = vld [vmem:[#allocation5 + $0x604] sm:$0xf0]  ;;  %v2982_v25 = vor.u32 %v3752_v16, %v2981_v15  ;;  %v2966_v43 = vor.u32 %v3748_v44, %v2965_v42  ;;  %v3744_v57 = vld [vmem:[#allocation5 + $0x7cc] sm:$0xf0]  ;;  %v3165_v16 = vld [vmem:[#allocation5 + $0x158] sm:$0xf] }
  0x95   :  { %1288 = vmatpush.bf16.msra.mxu0 %v3014_v40  ;;  %v3046_v30 = vor.u32 %v3768_v21, %v3045_v20  ;;  %v3741_v20 = vld [vmem:[#allocation5 + $0x61c] sm:$0xf0]  ;;  %v3740_v33 = vld [vmem:[#allocation5 + $0x58c] sm:$0xf0] }
  0x96   :  { %1301 = vmatpush.bf16.msra.mxu1 %v3078_v46  ;;  %v3739_v42 = vld [vmem:[#allocation5 + $0x4fc] sm:$0xf0] }
  0x97   :  { %1314 = vmatpush.bf16.msra.mxu2 %v3018_v29  ;;  %v3750_v29 = vld [vmem:[#allocation5 + $0xf4] sm:$0xf0] }
  0x98   :  { %1327 = vmatpush.bf16.msra.mxu3 %v3082_v35  ;;  %v3738_v35 = vld [vmem:[#allocation5 + $0x46c] sm:$0xf0]  ;;  %v2974_v40 = vor.u32 %v3750_v29, %v2973_v28 }
  0x99   :  { %1289 = vmatpush.bf16.msra.mxu0 %v3006_v54  ;;  %v3186_v46 = vor.u32 %v3738_v35, %v3185_v31  ;;  %v3213_v54 = vld [vmem:[#allocation5 + $0x818] sm:$0xf] }
  0x9a   :  { %1302 = vmatpush.bf16.msra.mxu1 %v3070_v48  ;;  %v3177_v48 = vld [vmem:[#allocation5 + $0x308] sm:$0xf] }
  0x9b   :  { %1315 = vmatpush.bf16.msra.mxu2 %v3010_v41  ;;  %v2970_v41 = vor.u32 %v3747_v24, %v2967_v27  ;;  %v3178_v62 = vor.u32 %v3736_v59, %v3177_v48  ;;  %v3732_v27 = vld [vmem:[#allocation5 + $0x10c] sm:$0xf0] }
  0x9c   :  { %1328 = vmatpush.bf16.msra.mxu3 %v3074_v49  ;;  %v3029_v49 = vld [vmem:[#allocation5 + $0x4a0] sm:$0xf] }
  0x9d   :  { %1290 = vmatpush.bf16.msra.mxu0 %v2998_v0  ;;  %v3030_v56 = vor.u32 %v3764_v50, %v3029_v49  ;;  %v3735_v0 = vld [vmem:[#allocation5 + $0x2bc] sm:$0xf0]  ;;  %v62_v50 = vld [vmem:[#allocation7 + $0x10] sm:$0xff] }
  0x9e   :  { %1303 = vmatpush.bf16.msra.mxu1 %v3062_v4  ;;  %v3174_v4 = vor.u32 %v3735_v0, %v3173_v63  ;;  %v3794_v63 = vld [vmem:[#allocation5 + $0x8f0] sm:$0xf0]  ;;  %v3113_v0 = vld [vmem:[#allocation5 + $0x30c] sm:$0xf] }
  0x9f   :  { %1316 = vmatpush.bf16.msra.mxu2 %v3002_v55  ;;  %v3745_v55 = vld [vmem:[#allocation5 + $0x85c] sm:$0xf0] }
  0xa0   :  { %1329 = vmatpush.bf16.msra.mxu3 %v3066_v60  ;;  %v3214_v60 = vor.u32 %v3745_v55, %v3213_v54 }
  0xa1   :  { %1291 = vmatpush.bf16.msra.mxu0 %v2990_v12 }
  0xa2   :  { %1304 = vmatpush.bf16.msra.mxu1 %v3054_v17  ;;  %v3733_v17 = vld [vmem:[#allocation5 + $0x19c] sm:$0xf0] }
  0xa3   :  { %1317 = vmatpush.bf16.msra.mxu2 %v2994_v6  ;;  %v3210_v6 = vor.u32 %v3744_v57, %v3209_v61  ;;  %v3166_v23 = vor.u32 %v3733_v17, %v3165_v16  ;;  %v3785_v61 = vld [vmem:[#allocation5 + $0x3e0] sm:$0xf0]  ;;  %v3153_v57 = vld [vmem:[#allocation5 + $0x8ac] sm:$0xf]  ;;  %v3809_v17 = vld [vmem:[#allocation5 + $0x41c] sm:$0xf] }
  0xa4   :  { %1330 = vmatpush.bf16.msra.mxu3 %v3058_v7  ;;  %v3734_v7 = vld [vmem:[#allocation5 + $0x22c] sm:$0xf0]  ;;  %v3154_v2 = vor.u32 %v3794_v63, %v3153_v57  ;;  %v64_v16 = vld [vmem:[#allocation7 + $0x20] sm:$0xff]  ;;  %v3803_v63 = vld [vmem:[#allocation5 + $0x26c] sm:$0xf] }
  0xa5   :  { %1292 = vmatpush.bf16.msra.mxu0 %v2982_v25  ;;  %v3170_v14 = vor.u32 %v3734_v7, %v3169_v5 }
  0xa6   :  { %1305 = vmatpush.bf16.msra.mxu1 %v3046_v30 }
  0xa7   :  { %1318 = vmatpush.bf16.msra.mxu2 %v2986_v13 }
  0xa8   :  { %1331 = vmatpush.bf16.msra.mxu3 %v3050_v19  ;;  %v3197_v19 = vld [vmem:[#allocation5 + $0x5d8] sm:$0xf] }
  0xa9   :  { %1293 = vmatpush.bf16.msra.mxu0 %v2974_v40  ;;  %v3198_v28 = vor.u32 %v3741_v20, %v3197_v19  ;;  %v3145_v19 = vld [vmem:[#allocation5 + $0x78c] sm:$0xf] }
  0xaa   :  { %1306 = vmatpush.bf16.msra.mxu1 %v3038_v45  ;;  %v3158_v45 = vor.u32 %v3731_v38, %v3157_v37  ;;  %v3791_v37 = vld [vmem:[#allocation5 + $0x740] sm:$0xf0]  ;;  %v3825_v38 = vld [vmem:[#allocation5 + $0x89c] sm:$0xf] }
  0xab   :  { %1319 = vmatpush.bf16.msra.mxu2 %v2978_v26  ;;  %v3161_v26 = vld [vmem:[#allocation5 + $0xc8] sm:$0xf] }
  0xac   :  { %1332 = vmatpush.bf16.msra.mxu3 %v3042_v32  ;;  %v3193_v32 = vld [vmem:[#allocation5 + $0x548] sm:$0xf]  ;;  %v3162_v36 = vor.u32 %v3732_v27, %v3161_v26 }
  0xad   :  { %1294 = vmatpush.bf16.msra.mxu0 %v2966_v43  ;;  %v469_v9 = vpop.f32.mrf.mxu0  ;;  %v3194_v39 = vor.u32 %v3740_v33, %v3193_v32  ;;  %v3807_v33 = vld [vmem:[#allocation5 + $0x38c] sm:$0xf] }
  0xae   :  { %1307 = vmatpush.bf16.msra.mxu1 %v3030_v56  ;;  %v470_v12 = vadd.f32 %v469_v9, %v60_v3  ;;  %v482_v13 = vpop.f32.mrf.mxu1  ;;  %v63_v56 = vld [vmem:[#allocation7 + $0x18] sm:$0xff] }
  0xaf   :  { %1320 = vmatpush.bf16.msra.mxu2 %v2970_v41  ;;  %v3189_v41 = vld [vmem:[#allocation5 + $0x4b8] sm:$0xf]  ;;  %v3149_v9 = vld [vmem:[#allocation5 + $0x81c] sm:$0xf] }
  0xb0   :  { %1333 = vmatpush.bf16.msra.mxu3 %v3034_v47  ;;  %v483_v15 = vadd.f32 %v482_v13, %v470_v12  ;;  %v3190_v47 = vor.u32 %v3739_v42, %v3189_v41  ;;  %v3150_v12 = vor.u32 %v3793_v10, %v3149_v9  ;;  %v3783_v13 = vld [vmem:[#allocation5 + $0x2c0] sm:$0xf0]  ;;  %v3093_v9 = vld [vmem:[#allocation5 + $0x3c] sm:$0xf] }
  0xb1   :  { %v3779_v10 = vld [vmem:[#allocation5 + $0x80] sm:$0xf0] }
  0xb2   :  { %v1059_v21 = vmax.f32 %v483_v15, 0.0  ;;  %1486 = vmatpush.bf16.msrb.mxu1 %v3154_v2  ;;  %v3789_v2 = vld [vmem:[#allocation5 + $0x620] sm:$0xf0] }
  0xb3   :  { %1595 = vmatpush.bf16.msrb.mxu2 %v3186_v46 }
  0xb4   :  { %1608 = vmatpush.bf16.msrb.mxu3 %v3218_v53  ;;  %v1061_v24 = vpack.c.bf16 %v1059_v21, %v1059_v21  ;;  %v3122_v53 = vor.u32 %v3786_v52, %v3121_v51  ;;  %v3792_v21 = vld [vmem:[#allocation5 + $0x7d0] sm:$0xf0]  ;;  %v3263_v51 = vld [vmem:[#allocation5 + $0x340] sm:$0xf0]  ;;  %v3137_v52 = vld [vmem:[#allocation5 + $0x66c] sm:$0xf] }
  0xb5   :  { %v495_v25 = vpop.f32.mrf.mxu2  ;;  %v471_v31 = vpop.f32.mrf.mxu0 }
  0xb6   :  { %v496_v29 = vadd.f32 %v495_v25, %v61_v22  ;;  %v508_v30 = vpop.f32.mrf.mxu3  ;;  %v484_v34 = vpop.f32.mrf.mxu1  ;;  %1295 = vmatmul.bf16.vlgmr.msra.gmra.mxu0 %v1061_v24  ;;  %1321 = vmatmul.bf16.vlgmr.msra.gmra.mxu2 %v1061_v24  ;;  %v3105_v22 = vld [vmem:[#allocation5 + $0x1ec] sm:$0xf]  ;;  %v3146_v25 = vor.u32 %v3792_v21, %v3145_v19 }
  0xb7   :  { %1596 = vmatpush.bf16.msrb.mxu2 %v3182_v58  ;;  %1473 = vmatpush.bf16.msrb.mxu0 %v3122_v53  ;;  %v3271_v34 = vld [vmem:[#allocation5 + $0x3d0] sm:$0xf0] }
  0xb8   :  { %1609 = vmatpush.bf16.msrb.mxu3 %v3214_v60  ;;  %v509_v35 = vadd.f32 %v508_v30, %v496_v29  ;;  %v3117_v60 = vld [vmem:[#allocation5 + $0x39c] sm:$0xf]  ;;  %1487 = vmatpush.bf16.msrb.mxu1 %v3150_v12  ;;  %v65_v29 = vld [vmem:[#allocation7 + $0x28] sm:$0xff]  ;;  %v3790_v53 = vld [vmem:[#allocation5 + $0x6b0] sm:$0xf0]  ;;  %v3094_v12 = vor.u32 %v3779_v10, %v3093_v9 }
  0xb9   :  { %v3223_v10 = vld [vmem:[#allocation5 + $0x70] sm:$0xf0] }
  0xba   :  { %v1060_v40 = vmax.f32 %v509_v35, 0.0  ;;  %v3141_v35 = vld [vmem:[#allocation5 + $0x6fc] sm:$0xf] }
  0xbb   :  { %1597 = vmatpush.bf16.msrb.mxu2 %v3178_v62  ;;  %v3118_v62 = vor.u32 %v3785_v61, %v3117_v60  ;;  %v3142_v41 = vor.u32 %v3791_v37, %v3141_v35  ;;  %v3780_v61 = vld [vmem:[#allocation5 + $0x110] sm:$0xf0] }
  0xbc   :  { %1610 = vmatpush.bf16.msrb.mxu3 %v3210_v6  ;;  %v1062_v44 = vpack.c.bf16 %v1060_v40, %v1060_v40  ;;  %v3784_v6 = vld [vmem:[#allocation5 + $0x350] sm:$0xf0]  ;;  %1488 = vmatpush.bf16.msrb.mxu1 %v3146_v25  ;;  %v3277_v25 = vld [vmem:[#allocation5 + $0x418] sm:$0xf] }
  0xbd   :  { %v497_v46 = vpop.f32.mrf.mxu2  ;;  %1474 = vmatpush.bf16.msrb.mxu0 %v3118_v62  ;;  %v3114_v5 = vor.u32 %v3784_v6, %v3113_v0  ;;  %v3255_v0 = vld [vmem:[#allocation5 + $0x2b0] sm:$0xf0]  ;;  %v3133_v6 = vld [vmem:[#allocation5 + $0x5dc] sm:$0xf] }
  0xbe   :  { %v510_v49 = vpop.f32.mrf.mxu3  ;;  %1308 = vmatmul.bf16.vlgmr.msra.gmra.mxu1 %v1062_v44  ;;  %1334 = vmatmul.bf16.vlgmr.msra.gmra.mxu3 %v1062_v44  ;;  %v3805_v46 = vld [vmem:[#allocation5 + $0x2fc] sm:$0xf]  ;;  %v3319_v37 = vld [vmem:[#allocation5 + $0x730] sm:$0xf0] }
  0xbf   :  { %1598 = vmatpush.bf16.msrb.mxu2 %v3174_v4 }
  0xc0   :  { %1611 = vmatpush.bf16.msrb.mxu3 %v3206_v8  ;;  %1489 = vmatpush.bf16.msrb.mxu1 %v3142_v41  ;;  %v3799_v41 = vld [vmem:[#allocation5 + $0x14c] sm:$0xf] }
  0xc1   :  { %1475 = vmatpush.bf16.msrb.mxu0 %v3114_v5  ;;  %v3327_v5 = vld [vmem:[#allocation5 + $0x7c0] sm:$0xf0] }
  0xc3   :  { %1599 = vmatpush.bf16.msrb.mxu2 %v3170_v14  ;;  %v3110_v14 = vor.u32 %v3783_v13, %v3109_v11  ;;  %v66_v13 = vld [vmem:[#allocation7 + $0x30] sm:$0xff] }
  0xc4   :  { %1612 = vmatpush.bf16.msrb.mxu3 %v3202_v18  ;;  %v3279_v18 = vld [vmem:[#allocation5 + $0x460] sm:$0xf0] }
  0xc5   :  { %1476 = vmatpush.bf16.msrb.mxu0 %v3110_v14  ;;  %v3282_v20 = vor.u32 %v3809_v17, %v3279_v18  ;;  %v67_v17 = vld [vmem:[#allocation7 + $0x38] sm:$0xff] }
  0xc7   :  { %1600 = vmatpush.bf16.msrb.mxu2 %v3166_v23  ;;  %v3782_v23 = vld [vmem:[#allocation5 + $0x230] sm:$0xf0] }
  0xc8   :  { %1613 = vmatpush.bf16.msrb.mxu3 %v3198_v28  ;;  %v3106_v26 = vor.u32 %v3782_v23, %v3105_v22 }
  0xca   :  { %1477 = vmatpush.bf16.msrb.mxu0 %v3106_v26  ;;  %v3810_v26 = vld [vmem:[#allocation5 + $0x45c] sm:$0xf0] }
  0xcb   :  { %1601 = vmatpush.bf16.msrb.mxu2 %v3162_v36  ;;  %v3274_v36 = vor.u32 %v3807_v33, %v3271_v34  ;;  %v3788_v33 = vld [vmem:[#allocation5 + $0x590] sm:$0xf0] }
  0xcc   :  { %1614 = vmatpush.bf16.msrb.mxu3 %v3194_v39  ;;  %v3343_v39 = vld [vmem:[#allocation5 + $0x8e0] sm:$0xf0] }
  0xcd   :  { %v521_v54 = vpop.f32.mrf.mxu0  ;;  %v3346_v42 = vor.u32 %v3825_v38, %v3343_v39  ;;  %v3269_v38 = vld [vmem:[#allocation5 + $0x388] sm:$0xf] }
  0xce   :  { %v522_v55 = vadd.f32 %v521_v54, %v62_v50  ;;  %v534_v43 = vpop.f32.mrf.mxu1 }
  0xcf   :  { %1602 = vmatpush.bf16.msrb.mxu2 %v3158_v45  ;;  %v3781_v45 = vld [vmem:[#allocation5 + $0x1a0] sm:$0xf0] }
  0xd0   :  { %1615 = vmatpush.bf16.msrb.mxu3 %v3190_v47  ;;  %v4058_v58 = vadd.f32 %v534_v43, %v522_v55  ;;  %v3266_v55 = vor.u32 %v3805_v46, %v3263_v51  ;;  %v3138_v43 = vor.u32 %v3790_v53, %v3137_v52  ;;  %v3125_v46 = vld [vmem:[#allocation5 + $0x4bc] sm:$0xf]  ;;  %v3341_v52 = vld [vmem:[#allocation5 + $0x898] sm:$0xf]  ;;  %v3826_v53 = vld [vmem:[#allocation5 + $0x8dc] sm:$0xf0] }
  0xd2   :  { %1603 = vmatmul.bf16.vlgmr.msrb.gmra.mxu2 %v1061_v24  ;;  %1490 = vmatpush.bf16.msrb.mxu1 %v3138_v43  ;;  %v3311_v43 = vld [vmem:[#allocation5 + $0x6a0] sm:$0xf0] }
  0xd3   :  { %1616 = vmatmul.bf16.vlgmr.msrb.gmra.mxu3 %v1062_v44  ;;  %1839 = vmatpush.bf16.msra.mxu2 %v3282_v20  ;;  %v3101_v44 = vld [vmem:[#allocation5 + $0x15c] sm:$0xf] }
  0xd4   :  { %v3102_v50 = vor.u32 %v3781_v45, %v3101_v44  ;;  %1852 = vmatpush.bf16.msra.mxu3 %v3346_v42  ;;  %v3239_v42 = vld [vmem:[#allocation5 + $0x190] sm:$0xf0] }
  0xd5   :  { %v547_v48 = vpop.f32.mrf.mxu2  ;;  %v523_v4 = vpop.f32.mrf.mxu0  ;;  %v3242_v45 = vor.u32 %v3799_v41, %v3239_v42  ;;  %v3221_v42 = vld [vmem:[#allocation5 + $0x28] sm:$0xf] }
  0xd6   :  { %v548_v59 = vadd.f32 %v547_v48, %v63_v56  ;;  %v560_v1 = vpop.f32.mrf.mxu3  ;;  %v536_v7 = vpop.f32.mrf.mxu1  ;;  %v3823_v56 = vld [vmem:[#allocation5 + $0x80c] sm:$0xf]  ;;  %v3335_v48 = vld [vmem:[#allocation5 + $0x850] sm:$0xf0]  ;;  %1478 = vmatpush.bf16.msrb.mxu0 %v3102_v50  ;;  %v3821_v4 = vld [vmem:[#allocation5 + $0x77c] sm:$0xf] }
  0xd7   :  { %1840 = vmatpush.bf16.msra.mxu2 %v3274_v36  ;;  %v3338_v60 = vor.u32 %v3823_v56, %v3335_v48  ;;  %v3134_v7 = vor.u32 %v3789_v2, %v3133_v6  ;;  %v3819_v36 = vld [vmem:[#allocation5 + $0x6ec] sm:$0xf]  ;;  %v3261_v48 = vld [vmem:[#allocation5 + $0x2f8] sm:$0xf]  ;;  %v3303_v2 = vld [vmem:[#allocation5 + $0x610] sm:$0xf0] }
  0xd8   :  { %v4060_v3 = vadd.f32 %v560_v1, %v548_v59  ;;  %v3097_v59 = vld [vmem:[#allocation5 + $0xcc] sm:$0xf]  ;;  %v3258_v1 = vor.u32 %v3803_v63, %v3255_v0  ;;  %v3322_v39 = vor.u32 %v3819_v36, %v3319_v37  ;;  %v3333_v63 = vld [vmem:[#allocation5 + $0x808] sm:$0xf]  ;;  %v3824_v0 = vld [vmem:[#allocation5 + $0x84c] sm:$0xf0] }
  0xd9   :  { %v3098_v62 = vor.u32 %v3780_v61, %v3097_v59  ;;  %1853 = vmatpush.bf16.msra.mxu3 %v3338_v60  ;;  %1491 = vmatpush.bf16.msrb.mxu1 %v3134_v7  ;;  %v3806_v59 = vld [vmem:[#allocation5 + $0x33c] sm:$0xf0]  ;;  %v3797_v60 = vld [vmem:[#allocation5 + $0xbc] sm:$0xf]  ;;  %v3815_v6 = vld [vmem:[#allocation5 + $0x5cc] sm:$0xf] }
  0xda   :  { %v3262_v61 = vor.u32 %v3806_v59, %v3261_v48  ;;  %v3804_v7 = vld [vmem:[#allocation5 + $0x2ac] sm:$0xf0]  ;;  %v3229_v36 = vld [vmem:[#allocation5 + $0xb8] sm:$0xf]  ;;  %v3798_v37 = vld [vmem:[#allocation5 + $0xfc] sm:$0xf0] }
  0xdb   :  { %1841 = vmatpush.bf16.msra.mxu2 %v3266_v55  ;;  %1479 = vmatpush.bf16.msrb.mxu0 %v3098_v62  ;;  %v3342_v55 = vor.u32 %v3826_v53, %v3341_v52  ;;  %v3285_v52 = vld [vmem:[#allocation5 + $0x4a8] sm:$0xf]  ;;  %v3812_v53 = vld [vmem:[#allocation5 + $0x4ec] sm:$0xf0]  ;;  %v3533_v59 = vld [vmem:[#allocation5 + $0x8a0] sm:$0xf] }
  0xdd   :  { %v549_v8 = vpop.f32.mrf.mxu2 }
  0xde   :  { %v562_v15 = vpop.f32.mrf.mxu3  ;;  %v3330_v8 = vor.u32 %v3821_v4, %v3327_v5  ;;  %v3306_v4 = vor.u32 %v3815_v6, %v3303_v2  ;;  %v3253_v5 = vld [vmem:[#allocation5 + $0x268] sm:$0xf]  ;;  %v3872_v6 = vld [vmem:[#allocation5 + $0x854] sm:$0xf0] }
  0xdf   :  { %1842 = vmatpush.bf16.msra.mxu2 %v3258_v1  ;;  %1480 = vmatpush.bf16.msrb.mxu0 %v3094_v12  ;;  %v3334_v1 = vor.u32 %v3824_v0, %v3333_v63  ;;  %v3254_v9 = vor.u32 %v3804_v7, %v3253_v5  ;;  %v3325_v12 = vld [vmem:[#allocation5 + $0x778] sm:$0xf]  ;;  %v3525_v0 = vld [vmem:[#allocation5 + $0x810] sm:$0xf]  ;;  %v3373_v5 = vld [vmem:[#allocation5 + $0x3a0] sm:$0xf] }
  0xe0   :  { %1854 = vmatpush.bf16.msra.mxu3 %v3330_v8  ;;  %v3795_v8 = vld [vmem:[#allocation5 + $0x2c] sm:$0xf]  ;;  %v3526_v7 = vor.u32 %v3872_v6, %v3525_v0  ;;  %v3856_v0 = vld [vmem:[#allocation5 + $0x3d4] sm:$0xf0] }
  0xe4   :  { %1855 = vmatpush.bf16.msra.mxu3 %v3322_v39  ;;  %v3230_v39 = vor.u32 %v3798_v37, %v3229_v36 }
  0xed   :  { %v964_v24 = vpop.f32.mrf.mxu0 }
  0xee   :  { %v965_v27 = vadd.f32 %v964_v24, %v64_v16  ;;  %v977_v28 = vpop.f32.mrf.mxu1 }
  0xf0   :  { %v4062_v30 = vadd.f32 %v977_v28, %v965_v27  ;;  %v3801_v27 = vld [vmem:[#allocation5 + $0x1dc] sm:$0xf] }
  0xf5   :  { %v990_v31 = vpop.f32.mrf.mxu2  ;;  %v966_v49 = vpop.f32.mrf.mxu0 }
  0xf6   :  { %v991_v32 = vadd.f32 %v990_v31, %v65_v29  ;;  %v1003_v40 = vpop.f32.mrf.mxu3  ;;  %v979_v54 = vpop.f32.mrf.mxu1  ;;  %v3278_v29 = vor.u32 %v3810_v26, %v3277_v25  ;;  %v3247_v31 = vld [vmem:[#allocation5 + $0x220] sm:$0xf0]  ;;  %v3811_v25 = vld [vmem:[#allocation5 + $0x4ac] sm:$0xf] }
  0xf7   :  { %v3250_v34 = vor.u32 %v3801_v27, %v3247_v31  ;;  %v3787_v49 = vld [vmem:[#allocation5 + $0x500] sm:$0xf0]  ;;  %v3817_v54 = vld [vmem:[#allocation5 + $0x65c] sm:$0xf]  ;;  %v3287_v27 = vld [vmem:[#allocation5 + $0x4f0] sm:$0xf0] }
  0xf8   :  { %v4064_v47 = vadd.f32 %v1003_v40, %v991_v32  ;;  %v3129_v32 = vld [vmem:[#allocation5 + $0x54c] sm:$0xf]  ;;  %1813 = vmatpush.bf16.msra.mxu0 %v3278_v29  ;;  %v3808_v40 = vld [vmem:[#allocation5 + $0x3cc] sm:$0xf0]  ;;  %v3126_v51 = vor.u32 %v3787_v49, %v3125_v46  ;;  %v3314_v56 = vor.u32 %v3817_v54, %v3311_v43  ;;  %v3237_v29 = vld [vmem:[#allocation5 + $0x148] sm:$0xf]  ;;  %v3286_v54 = vor.u32 %v3812_v53, %v3285_v52 }
  0xf9   :  { %v3130_v35 = vor.u32 %v3788_v33, %v3129_v32  ;;  %1843 = vmatpush.bf16.msra.mxu2 %v3250_v34  ;;  %v3270_v44 = vor.u32 %v3808_v40, %v3269_v38  ;;  %v3800_v31 = vld [vmem:[#allocation5 + $0x18c] sm:$0xf0]  ;;  %v3309_v33 = vld [vmem:[#allocation5 + $0x658] sm:$0xf]  ;;  %v3818_v34 = vld [vmem:[#allocation5 + $0x69c] sm:$0xf0] }
  0xfa   :  { %1856 = vmatpush.bf16.msra.mxu3 %v3314_v56  ;;  %v3238_v32 = vor.u32 %v3800_v31, %v3237_v29  ;;  %v3301_v38 = vld [vmem:[#allocation5 + $0x5c8] sm:$0xf]  ;;  %v3816_v40 = vld [vmem:[#allocation5 + $0x60c] sm:$0xf0]  ;;  %v3293_v46 = vld [vmem:[#allocation5 + $0x538] sm:$0xf] }
  0xfb   :  { %1492 = vmatpush.bf16.msrb.mxu1 %v3130_v35  ;;  %v3310_v35 = vor.u32 %v3818_v34, %v3309_v33  ;;  %v3302_v41 = vor.u32 %v3816_v40, %v3301_v38  ;;  %v3814_v49 = vld [vmem:[#allocation5 + $0x57c] sm:$0xf0]  ;;  %v3401_v34 = vld [vmem:[#allocation5 + $0x790] sm:$0xf] }
  0xfc   :  { %1814 = vmatpush.bf16.msra.mxu0 %v3270_v44  ;;  %v3796_v44 = vld [vmem:[#allocation5 + $0x6c] sm:$0xf0]  ;;  %v3365_v31 = vld [vmem:[#allocation5 + $0x280] sm:$0xf] }
  0xfd   :  { %v992_v57 = vpop.f32.mrf.mxu2  ;;  %1844 = vmatpush.bf16.msra.mxu2 %v3242_v45  ;;  %v3222_v45 = vor.u32 %v3796_v44, %v3221_v42  ;;  %v3397_v38 = vld [vmem:[#allocation5 + $0x700] sm:$0xf]  ;;  %v3393_v44 = vld [vmem:[#allocation5 + $0x670] sm:$0xf] }
  0xfe   :  { %v1005_v11 = vpop.f32.mrf.mxu3  ;;  %v3231_v57 = vld [vmem:[#allocation5 + $0x100] sm:$0xf0]  ;;  %1857 = vmatpush.bf16.msra.mxu3 %v3306_v4  ;;  %v3469_v53 = vld [vmem:[#allocation5 + $0x420] sm:$0xf] }
  0xff   :  { %1493 = vmatpush.bf16.msrb.mxu1 %v3126_v51  ;;  %v3234_v62 = vor.u32 %v3797_v60, %v3231_v57  ;;  %v3226_v11 = vor.u32 %v3795_v8, %v3223_v10  ;;  %v3874_v60 = vld [vmem:[#allocation5 + $0x8e4] sm:$0xf0]  ;;  %v3377_v57 = vld [vmem:[#allocation5 + $0x430] sm:$0xf] }
 0x100   :  { %1815 = vmatpush.bf16.msra.mxu0 %v3262_v61  ;;  %v3534_v63 = vor.u32 %v3874_v60, %v3533_v59  ;;  %v3509_v59 = vld [vmem:[#allocation5 + $0x6f0] sm:$0xf]  ;;  %v3868_v60 = vld [vmem:[#allocation5 + $0x734] sm:$0xf0] }
 0x101   :  { %1845 = vmatpush.bf16.msra.mxu2 %v3234_v62  ;;  %v3834_v62 = vld [vmem:[#allocation5 + $0x474] sm:$0xf0] }
 0x102   :  { %v3378_v4 = vor.u32 %v3834_v62, %v3377_v57  ;;  %v3510_v57 = vor.u32 %v3868_v60, %v3509_v59  ;;  %v3830_v62 = vld [vmem:[#allocation5 + $0x234] sm:$0xf0]  ;;  %v3855_v60 = vld [vmem:[#allocation5 + $0x394] sm:$0xf] }
 0x103   :  { %1826 = vmatpush.bf16.msra.mxu1 %v3342_v55  ;;  %v3848_v59 = vld [vmem:[#allocation5 + $0x194] sm:$0xf0] }
 0x104   :  { %1816 = vmatpush.bf16.msra.mxu0 %v3254_v9 }
 0x105   :  { %1846 = vmatpush.bf16.msra.mxu2 %v3226_v11  ;;  %v3833_v11 = vld [vmem:[#allocation5 + $0x3e4] sm:$0xf0] }
 0x107   :  { %1827 = vmatpush.bf16.msra.mxu1 %v3334_v1 }
 0x10d   :  { %v1016_v14 = vpop.f32.mrf.mxu0 }
 0x10e   :  { %v1017_v15 = vadd.f32 %v1016_v14, %v66_v13  ;;  %v1029_v16 = vpop.f32.mrf.mxu1  ;;  %v3822_v13 = vld [vmem:[#allocation5 + $0x7bc] sm:$0xf0]  ;;  %v3813_v14 = vld [vmem:[#allocation5 + $0x53c] sm:$0xf] }
 0x110   :  { %v4066_v18 = vadd.f32 %v1029_v16, %v1017_v15  ;;  %v3326_v15 = vor.u32 %v3822_v13, %v3325_v12  ;;  %v3295_v16 = vld [vmem:[#allocation5 + $0x580] sm:$0xf0]  ;;  %v3517_v12 = vld [vmem:[#allocation5 + $0x780] sm:$0xf]  ;;  %v3870_v13 = vld [vmem:[#allocation5 + $0x7c4] sm:$0xf0] }
 0x112   :  { %1828 = vmatpush.bf16.msra.mxu1 %v3326_v15  ;;  %v3409_v15 = vld [vmem:[#allocation5 + $0x8b0] sm:$0xf] }
 0x115   :  { %v1042_v19 = vpop.f32.mrf.mxu2  ;;  %v1018_v23 = vpop.f32.mrf.mxu0 }
 0x116   :  { %v1043_v20 = vadd.f32 %v1042_v19, %v67_v17  ;;  %v1055_v21 = vpop.f32.mrf.mxu3  ;;  %v1031_v24 = vpop.f32.mrf.mxu1  ;;  %v3298_v17 = vor.u32 %v3813_v14, %v3295_v16  ;;  %v3245_v19 = vld [vmem:[#allocation5 + $0x1d8] sm:$0xf]  ;;  %v3317_v23 = vld [vmem:[#allocation5 + $0x6e8] sm:$0xf] }
 0x117   :  { %v3820_v24 = vld [vmem:[#allocation5 + $0x72c] sm:$0xf0]  ;;  %v3842_v16 = vld [vmem:[#allocation5 + $0x8f4] sm:$0xf0] }
 0x118   :  { %v4068_v22 = vadd.f32 %v1055_v21, %v1043_v20  ;;  %v3802_v20 = vld [vmem:[#allocation5 + $0x21c] sm:$0xf0]  ;;  %1858 = vmatpush.bf16.msra.mxu3 %v3298_v17  ;;  %v3318_v26 = vor.u32 %v3820_v24, %v3317_v23  ;;  %v3374_v17 = vor.u32 %v3833_v11, %v3373_v5  ;;  %v3832_v23 = vld [vmem:[#allocation5 + $0x354] sm:$0xf0]  ;;  %v3410_v24 = vor.u32 %v3842_v16, %v3409_v15  ;;  %v3535_v11 = vld [vmem:[#allocation5 + $0x8e8] sm:$0xf0] }
 0x119   :  { %v3246_v21 = vor.u32 %v3802_v20, %v3245_v19  ;;  %v3518_v19 = vor.u32 %v3870_v13, %v3517_v12  ;;  %v3357_v12 = vld [vmem:[#allocation5 + $0x160] sm:$0xf]  ;;  %v3829_v13 = vld [vmem:[#allocation5 + $0x1a4] sm:$0xf0] }
 0x11a   :  { %1829 = vmatpush.bf16.msra.mxu1 %v3318_v26  ;;  %v3405_v26 = vld [vmem:[#allocation5 + $0x820] sm:$0xf]  ;;  %v3854_v16 = vld [vmem:[#allocation5 + $0x344] sm:$0xf0] }
 0x11b   :  { %1817 = vmatpush.bf16.msra.mxu0 %v3246_v21  ;;  %v3369_v21 = vld [vmem:[#allocation5 + $0x310] sm:$0xf]  ;;  %v3453_v15 = vld [vmem:[#allocation5 + $0x300] sm:$0xf] }
 0x11c   :  { %v3370_v29 = vor.u32 %v3832_v23, %v3369_v21  ;;  %v3871_v21 = vld [vmem:[#allocation5 + $0x814] sm:$0xf] }
 0x11d   :  { %v1044_v28 = vpop.f32.mrf.mxu2 }
 0x11e   :  { %v1057_v50 = vpop.f32.mrf.mxu3  ;;  %v3290_v28 = vor.u32 %v3811_v25, %v3287_v27  ;;  %1830 = vmatpush.bf16.msra.mxu1 %v3310_v35  ;;  %v3841_v27 = vld [vmem:[#allocation5 + $0x864] sm:$0xf0]  ;;  %v3840_v35 = vld [vmem:[#allocation5 + $0x7d4] sm:$0xf0] }
 0x11f   :  { %1818 = vmatpush.bf16.msra.mxu0 %v3238_v32  ;;  %v3294_v50 = vor.u32 %v3814_v49, %v3293_v46  ;;  %v3831_v32 = vld [vmem:[#allocation5 + $0x2c4] sm:$0xf0]  ;;  %v3406_v33 = vor.u32 %v3841_v27, %v3405_v26  ;;  %v3402_v37 = vor.u32 %v3840_v35, %v3401_v34  ;;  %v3389_v49 = vld [vmem:[#allocation5 + $0x5e0] sm:$0xf]  ;;  %v3828_v26 = vld [vmem:[#allocation5 + $0x114] sm:$0xf0] }
 0x120   :  { %1859 = vmatpush.bf16.msra.mxu3 %v3290_v28  ;;  %v3366_v36 = vor.u32 %v3831_v32, %v3365_v31  ;;  %v3852_v31 = vld [vmem:[#allocation5 + $0x2b4] sm:$0xf0]  ;;  %v3862_v34 = vld [vmem:[#allocation5 + $0x584] sm:$0xf0]  ;;  %v3869_v35 = vld [vmem:[#allocation5 + $0x784] sm:$0xf] }
 0x122   :  { %1831 = vmatpush.bf16.msra.mxu1 %v3302_v41 }
 0x123   :  { %1819 = vmatpush.bf16.msra.mxu0 %v3230_v39  ;;  %v3839_v39 = vld [vmem:[#allocation5 + $0x744] sm:$0xf0] }
 0x124   :  { %2231 = vmatpush.bf16.msrb.mxu3 %v3534_v63  ;;  %v3398_v42 = vor.u32 %v3839_v39, %v3397_v38  ;;  %v3461_v63 = vld [vmem:[#allocation5 + $0x390] sm:$0xf]  ;;  %v3349_v38 = vld [vmem:[#allocation5 + $0x40] sm:$0xf]  ;;  %v3827_v39 = vld [vmem:[#allocation5 + $0x84] sm:$0xf0] }
 0x126   :  { %1832 = vmatpush.bf16.msra.mxu1 %v3294_v50  ;;  %v3837_v50 = vld [vmem:[#allocation5 + $0x624] sm:$0xf0] }
 0x127   :  { %1820 = vmatpush.bf16.msra.mxu0 %v3222_v45  ;;  %v3838_v45 = vld [vmem:[#allocation5 + $0x6b4] sm:$0xf0]  ;;  %v3390_v52 = vor.u32 %v3837_v50, %v3389_v49  ;;  %v3471_v50 = vld [vmem:[#allocation5 + $0x468] sm:$0xf0] }
 0x128   :  { %2232 = vmatpush.bf16.msrb.mxu3 %v3526_v7  ;;  %v3394_v46 = vor.u32 %v3838_v45, %v3393_v44  ;;  %v3501_v7 = vld [vmem:[#allocation5 + $0x660] sm:$0xf]  ;;  %v3850_v45 = vld [vmem:[#allocation5 + $0x224] sm:$0xf0] }
 0x129   :  { %v3437_v44 = vld [vmem:[#allocation5 + $0x1e0] sm:$0xf] }
 0x12a   :  { %1833 = vmatpush.bf16.msra.mxu1 %v3286_v54  ;;  %v3858_v54 = vld [vmem:[#allocation5 + $0x464] sm:$0xf0]  ;;  %v3438_v49 = vor.u32 %v3850_v45, %v3437_v44 }
 0x12c   :  { %2233 = vmatpush.bf16.msrb.mxu3 %v3518_v19  ;;  %v3493_v19 = vld [vmem:[#allocation5 + $0x5d0] sm:$0xf] }
 0x130   :  { %2234 = vmatpush.bf16.msrb.mxu3 %v3510_v57  ;;  %v3463_v57 = vld [vmem:[#allocation5 + $0x3d8] sm:$0xf0] }
 0x133   :  { %v1296_v51 = vpop.f32.mrf.mxu0 }
 0x139   :  { %v1322_v55 = vpop.f32.mrf.mxu2 }
 0x13b   :  { %v1309_v43 = vpop.f32.mrf.mxu1  ;;  %v1298_v48 = vpop.f32.mrf.mxu0 }
 0x13c   :  { %v1310_v56 = vadd.f32 %v1309_v43, %v1296_v51  ;;  %v3385_v43 = vld [vmem:[#allocation5 + $0x550] sm:$0xf] }
 0x13e   :  { %v1339_v61 = vadd.f32 %v1310_v56, %v4062_v30  ;;  %v3836_v56 = vld [vmem:[#allocation5 + $0x594] sm:$0xf0] }
 0x13f   :  { %v3386_v48 = vor.u32 %v3836_v56, %v3385_v43  ;;  %v3511_v43 = vld [vmem:[#allocation5 + $0x738] sm:$0xf0] }
 0x140   :  { %v1341_v1 = vmax.f32 %v1339_v61, 0.0  ;;  %v3361_v61 = vld [vmem:[#allocation5 + $0x1f0] sm:$0xf] }
 0x141   :  { %v1335_v2 = vpop.f32.mrf.mxu3  ;;  %v1324_v10 = vpop.f32.mrf.mxu2  ;;  %v3362_v6 = vor.u32 %v3830_v62, %v3361_v61  ;;  %v3466_v62 = vor.u32 %v3855_v60, %v3463_v57 }
 0x142   :  { %v1343_v8 = vpack.c.bf16 %v1341_v1, %v1341_v1  ;;  %v1336_v9 = vadd.f32 %v1335_v2, %v1322_v55  ;;  %v3470_v55 = vor.u32 %v3858_v54, %v3469_v53  ;;  %v3462_v1 = vor.u32 %v3856_v0, %v3461_v63  ;;  %v3381_v2 = vld [vmem:[#allocation5 + $0x4c0] sm:$0xf]  ;;  %v3860_v53 = vld [vmem:[#allocation5 + $0x4f4] sm:$0xf0]  ;;  %v3867_v54 = vld [vmem:[#allocation5 + $0x6f4] sm:$0xf] }
 0x143   :  { %v1311_v14 = vpop.f32.mrf.mxu1  ;;  %v3514_v56 = vor.u32 %v3867_v54, %v3511_v43  ;;  %v3865_v63 = vld [vmem:[#allocation5 + $0x664] sm:$0xf]  ;;  %v3503_v0 = vld [vmem:[#allocation5 + $0x6a8] sm:$0xf0] }
 0x144   :  { %v1340_v30 = vadd.f32 %v1336_v9, %v4064_v47  ;;  %1481 = vmatmul.bf16.vlgmr.msrb.gmra.mxu0 %v1343_v8  ;;  %1847 = vmatmul.bf16.vlgmr.msra.gmra.mxu2 %v1343_v8  ;;  %v3873_v9 = vld [vmem:[#allocation5 + $0x8a4] sm:$0xf] }
 0x145   :  { %1999 = vmatpush.bf16.msrb.mxu0 %v3378_v4  ;;  %2218 = vmatpush.bf16.msrb.mxu2 %v3470_v55  ;;  %v3835_v4 = vld [vmem:[#allocation5 + $0x504] sm:$0xf0]  ;;  %v3538_v14 = vor.u32 %v3873_v9, %v3535_v11  ;;  %v3863_v9 = vld [vmem:[#allocation5 + $0x5d4] sm:$0xf]  ;;  %v3565_v54 = vld [vmem:[#allocation5 + $0x3a4] sm:$0xf] }
 0x146   :  { %v1342_v20 = vmax.f32 %v1340_v30, 0.0  ;;  %v3382_v5 = vor.u32 %v3835_v4, %v3381_v2  ;;  %v3358_v30 = vor.u32 %v3829_v13, %v3357_v12  ;;  %v3846_v2 = vld [vmem:[#allocation5 + $0x104] sm:$0xf0]  ;;  %v3853_v4 = vld [vmem:[#allocation5 + $0x304] sm:$0xf] }
 0x147   :  { %v3413_v12 = vld [vmem:[#allocation5 + $0x30] sm:$0xf]  ;;  %v3844_v13 = vld [vmem:[#allocation5 + $0x74] sm:$0xf0] }
 0x148   :  { %v1344_v25 = vpack.c.bf16 %v1342_v20, %v1342_v20  ;;  %v3864_v20 = vld [vmem:[#allocation5 + $0x614] sm:$0xf0] }
 0x149   :  { %v1337_v28 = vpop.f32.mrf.mxu3  ;;  %2000 = vmatpush.bf16.msrb.mxu0 %v3374_v17  ;;  %2219 = vmatpush.bf16.msrb.mxu2 %v3462_v1  ;;  %v3454_v17 = vor.u32 %v3854_v16, %v3453_v15  ;;  %v3494_v23 = vor.u32 %v3864_v20, %v3493_v19  ;;  %v3421_v1 = vld [vmem:[#allocation5 + $0xc0] sm:$0xf]  ;;  %v3447_v15 = vld [vmem:[#allocation5 + $0x2b8] sm:$0xf0]  ;;  %v3487_v19 = vld [vmem:[#allocation5 + $0x588] sm:$0xf0] }
 0x14a   :  { %1494 = vmatmul.bf16.vlgmr.msrb.gmra.mxu1 %v1344_v25  ;;  %1860 = vmatmul.bf16.vlgmr.msra.gmra.mxu3 %v1344_v25 }
 0x14b   :  { %2012 = vmatpush.bf16.msrb.mxu1 %v3410_v24  ;;  %v3527_v24 = vld [vmem:[#allocation5 + $0x858] sm:$0xf0] }
 0x14c   :  { %v3530_v27 = vor.u32 %v3871_v21, %v3527_v24  ;;  %v3849_v21 = vld [vmem:[#allocation5 + $0x1e4] sm:$0xf] }
 0x14d   :  { %2001 = vmatpush.bf16.msrb.mxu0 %v3370_v29  ;;  %2220 = vmatpush.bf16.msrb.mxu2 %v3454_v17  ;;  %v3445_v29 = vld [vmem:[#allocation5 + $0x270] sm:$0xf]  ;;  %v3861_v17 = vld [vmem:[#allocation5 + $0x544] sm:$0xf] }
 0x14e   :  { %v3446_v32 = vor.u32 %v3852_v31, %v3445_v29  ;;  %v3490_v20 = vor.u32 %v3861_v17, %v3487_v19  ;;  %v3431_v31 = vld [vmem:[#allocation5 + $0x198] sm:$0xf0]  ;;  %v3593_v17 = vld [vmem:[#allocation5 + $0x794] sm:$0xf] }
 0x14f   :  { %2013 = vmatpush.bf16.msrb.mxu1 %v3406_v33  ;;  %v3485_v33 = vld [vmem:[#allocation5 + $0x540] sm:$0xf]  ;;  %v3888_v19 = vld [vmem:[#allocation5 + $0x7d8] sm:$0xf0] }
 0x151   :  { %2002 = vmatpush.bf16.msrb.mxu0 %v3366_v36  ;;  %2221 = vmatpush.bf16.msrb.mxu2 %v3446_v32  ;;  %v3486_v36 = vor.u32 %v3862_v34, %v3485_v33  ;;  %v3845_v33 = vld [vmem:[#allocation5 + $0xc4] sm:$0xf]  ;;  %v3423_v34 = vld [vmem:[#allocation5 + $0x108] sm:$0xf0] }
 0x153   :  { %2014 = vmatpush.bf16.msrb.mxu1 %v3402_v37  ;;  %v3519_v37 = vld [vmem:[#allocation5 + $0x7c8] sm:$0xf0] }
 0x154   :  { %1821 = vmatmul.bf16.vlgmr.msra.gmra.mxu0 %v1343_v8  ;;  %v3866_v8 = vld [vmem:[#allocation5 + $0x6a4] sm:$0xf0] }
 0x155   :  { %v4072_v47 = vpop.f32.mrf.mxu2  ;;  %2003 = vmatpush.bf16.msrb.mxu0 %v3362_v6  ;;  %v3502_v10 = vor.u32 %v3866_v8, %v3501_v7  ;;  %2222 = vmatpush.bf16.msrb.mxu2 %v3438_v49  ;;  %v3506_v6 = vor.u32 %v3865_v63, %v3503_v0  ;;  %v3455_v7 = vld [vmem:[#allocation5 + $0x348] sm:$0xf0] }
 0x156   :  { %v4074_v40 = vpop.f32.mrf.mxu3  ;;  %v3458_v8 = vor.u32 %v3853_v4, %v3455_v7  ;;  %v3880_v4 = vld [vmem:[#allocation5 + $0x358] sm:$0xf0] }
 0x157   :  { %2015 = vmatpush.bf16.msrb.mxu1 %v3398_v42  ;;  %2235 = vmatpush.bf16.msrb.mxu3 %v3502_v10  ;;  %v3350_v42 = vor.u32 %v3827_v39, %v3349_v38  ;;  %v3495_v10 = vld [vmem:[#allocation5 + $0x618] sm:$0xf0]  ;;  %v3843_v39 = vld [vmem:[#allocation5 + $0x34] sm:$0xf] }
 0x158   :  { %v3498_v11 = vor.u32 %v3863_v9, %v3495_v10  ;;  %v3557_v10 = vld [vmem:[#allocation5 + $0x284] sm:$0xf] }
 0x159   :  { %2004 = vmatpush.bf16.msrb.mxu0 %v3358_v30  ;;  %v3414_v30 = vor.u32 %v3844_v13, %v3413_v12  ;;  %v3597_v13 = vld [vmem:[#allocation5 + $0x824] sm:$0xf] }
 0x15a   :  { %1834 = vmatmul.bf16.vlgmr.msra.gmra.mxu1 %v1344_v25  ;;  %v3353_v25 = vld [vmem:[#allocation5 + $0xd0] sm:$0xf] }
 0x15b   :  { %2016 = vmatpush.bf16.msrb.mxu1 %v3394_v46  ;;  %v3354_v28 = vor.u32 %v3828_v26, %v3353_v25  ;;  %2236 = vmatpush.bf16.msrb.mxu3 %v3494_v23  ;;  %v3857_v46 = vld [vmem:[#allocation5 + $0x424] sm:$0xf]  ;;  %v3439_v23 = vld [vmem:[#allocation5 + $0x228] sm:$0xf0]  ;;  %v3859_v25 = vld [vmem:[#allocation5 + $0x4b4] sm:$0xf] }
 0x15c   :  { %v3442_v24 = vor.u32 %v3849_v21, %v3439_v23  ;;  %v3479_v26 = vld [vmem:[#allocation5 + $0x4f8] sm:$0xf0]  ;;  %v3549_v21 = vld [vmem:[#allocation5 + $0x164] sm:$0xf]  ;;  %v3877_v23 = vld [vmem:[#allocation5 + $0x1a8] sm:$0xf0] }
 0x15d   :  { %v1606_v41 = vpop.f32.mrf.mxu2  ;;  %2005 = vmatpush.bf16.msrb.mxu0 %v3354_v28  ;;  %v3482_v29 = vor.u32 %v3859_v25, %v3479_v26  ;;  %v3589_v25 = vld [vmem:[#allocation5 + $0x704] sm:$0xf]  ;;  %v3887_v26 = vld [vmem:[#allocation5 + $0x748] sm:$0xf0] }
 0x15e   :  { %v1619_v51 = vpop.f32.mrf.mxu3  ;;  %v3522_v41 = vor.u32 %v3869_v35, %v3519_v37  ;;  %v3426_v37 = vor.u32 %v3845_v33, %v3423_v34  ;;  %v3886_v33 = vld [vmem:[#allocation5 + $0x6b8] sm:$0xf0] }
 0x15f   :  { %2017 = vmatpush.bf16.msrb.mxu1 %v3390_v52  ;;  %2237 = vmatpush.bf16.msrb.mxu3 %v3486_v36  ;;  %v3474_v51 = vor.u32 %v3857_v46, %v3471_v50  ;;  %v3477_v52 = vld [vmem:[#allocation5 + $0x4b0] sm:$0xf] }
 0x160   :  { %v3478_v55 = vor.u32 %v3860_v53, %v3477_v52  ;;  %v3569_v52 = vld [vmem:[#allocation5 + $0x434] sm:$0xf]  ;;  %v3882_v53 = vld [vmem:[#allocation5 + $0x478] sm:$0xf0] }
 0x161   :  { %2006 = vmatpush.bf16.msrb.mxu0 %v3350_v42  ;;  %v3570_v43 = vor.u32 %v3882_v53, %v3569_v52 }
 0x163   :  { %2018 = vmatpush.bf16.msrb.mxu1 %v3386_v48  ;;  %v3429_v48 = vld [vmem:[#allocation5 + $0x150] sm:$0xf]  ;;  %2238 = vmatpush.bf16.msrb.mxu3 %v3478_v55 }
 0x164   :  { %v3430_v61 = vor.u32 %v3848_v59, %v3429_v48 }
 0x165   :  { %2244 = vmatpush.bf16.msra.mxu0 %v3474_v51 }
 0x166   :  { %2223 = vmatpush.bf16.msrb.mxu2 %v3430_v61 }
 0x167   :  { %2019 = vmatpush.bf16.msrb.mxu1 %v3382_v5  ;;  %v3422_v5 = vor.u32 %v3846_v2, %v3421_v1  ;;  %v3561_v2 = vld [vmem:[#allocation5 + $0x314] sm:$0xf] }
 0x168   :  { %v3562_v7 = vor.u32 %v3880_v4, %v3561_v2 }
 0x169   :  { %2245 = vmatpush.bf16.msra.mxu0 %v3466_v62 }
 0x16a   :  { %2224 = vmatpush.bf16.msrb.mxu2 %v3422_v5  ;;  %v3601_v5 = vld [vmem:[#allocation5 + $0x8b4] sm:$0xf] }
 0x16b   :  { %2257 = vmatpush.bf16.msra.mxu1 %v3538_v14  ;;  %v3851_v14 = vld [vmem:[#allocation5 + $0x274] sm:$0xf] }
 0x16c   :  { %v3450_v16 = vor.u32 %v3851_v14, %v3447_v15  ;;  %v3878_v15 = vld [vmem:[#allocation5 + $0x238] sm:$0xf0] }
 0x16d   :  { %2246 = vmatpush.bf16.msra.mxu0 %v3458_v8  ;;  %v3890_v8 = vld [vmem:[#allocation5 + $0x8f8] sm:$0xf0] }
 0x16e   :  { %2225 = vmatpush.bf16.msrb.mxu2 %v3414_v30  ;;  %v3602_v9 = vor.u32 %v3890_v8, %v3601_v5  ;;  %v3553_v30 = vld [vmem:[#allocation5 + $0x1f4] sm:$0xf] }
 0x16f   :  { %2258 = vmatpush.bf16.msra.mxu1 %v3530_v27  ;;  %v3847_v27 = vld [vmem:[#allocation5 + $0x154] sm:$0xf] }
 0x170   :  { %v3434_v32 = vor.u32 %v3847_v27, %v3431_v31  ;;  %2417 = vmatpush.bf16.msra.mxu3 %v3602_v9  ;;  %v3590_v27 = vor.u32 %v3887_v26, %v3589_v25 }
 0x171   :  { %2247 = vmatpush.bf16.msra.mxu0 %v3450_v16  ;;  %v3554_v16 = vor.u32 %v3878_v15, %v3553_v30 }
 0x172   :  { %2404 = vmatpush.bf16.msra.mxu2 %v3570_v43 }
 0x173   :  { %2259 = vmatpush.bf16.msra.mxu1 %v3522_v41  ;;  %v3415_v41 = vld [vmem:[#allocation5 + $0x78] sm:$0xf0] }
 0x174   :  { %v3418_v44 = vor.u32 %v3843_v39, %v3415_v41  ;;  %v3581_v39 = vld [vmem:[#allocation5 + $0x5e4] sm:$0xf]  ;;  %v3885_v41 = vld [vmem:[#allocation5 + $0x628] sm:$0xf0] }
 0x175   :  { %2248 = vmatpush.bf16.msra.mxu0 %v3442_v24  ;;  %v3550_v24 = vor.u32 %v3877_v23, %v3549_v21 }
 0x177   :  { %2260 = vmatpush.bf16.msra.mxu1 %v3514_v56  ;;  %v3881_v56 = vld [vmem:[#allocation5 + $0x3e8] sm:$0xf0] }
 0x178   :  { %v3566_v59 = vor.u32 %v3881_v56, %v3565_v54 }
 0x179   :  { %2249 = vmatpush.bf16.msra.mxu0 %v3434_v32  ;;  %v3585_v32 = vld [vmem:[#allocation5 + $0x674] sm:$0xf] }
 0x17a   :  { %2405 = vmatpush.bf16.msra.mxu2 %v3566_v59  ;;  %v3586_v34 = vor.u32 %v3886_v33, %v3585_v32 }
 0x17b   :  { %2261 = vmatpush.bf16.msra.mxu1 %v3506_v6 }
 0x17d   :  { %2250 = vmatpush.bf16.msra.mxu0 %v3426_v37 }
 0x17e   :  { %2406 = vmatpush.bf16.msra.mxu2 %v3562_v7 }
 0x17f   :  { %2262 = vmatpush.bf16.msra.mxu1 %v3498_v11  ;;  %v3879_v11 = vld [vmem:[#allocation5 + $0x2c8] sm:$0xf0] }
 0x180   :  { %v3558_v12 = vor.u32 %v3879_v11, %v3557_v10 }
 0x181   :  { %2251 = vmatpush.bf16.msra.mxu0 %v3418_v44  ;;  %v3577_v44 = vld [vmem:[#allocation5 + $0x554] sm:$0xf] }
 0x182   :  { %2407 = vmatpush.bf16.msra.mxu2 %v3558_v12  ;;  %v68_v12 = vld [vmem:[#allocation7 + $0x40] sm:$0xff] }
 0x183   :  { %2263 = vmatpush.bf16.msra.mxu1 %v3490_v20  ;;  %v3594_v20 = vor.u32 %v3888_v19, %v3593_v17 }
 0x186   :  { %2408 = vmatpush.bf16.msra.mxu2 %v3554_v16 }
 0x187   :  { %2264 = vmatpush.bf16.msra.mxu1 %v3482_v29  ;;  %v3876_v29 = vld [vmem:[#allocation5 + $0x118] sm:$0xf0] }
 0x18a   :  { %2409 = vmatpush.bf16.msra.mxu2 %v3550_v24 }
 0x1c1   :  { %v1482_v28 = vpop.f32.mrf.mxu0 }
 0x1c7   :  { %v1495_v35 = vpop.f32.mrf.mxu1  ;;  %v1848_v36 = vpop.f32.mrf.mxu2 }
 0x1c8   :  { %v4076_v38 = vadd.f32 %v1495_v35, %v1482_v28  ;;  %v3545_v28 = vld [vmem:[#allocation5 + $0xd4] sm:$0xf]  ;;  %v3541_v35 = vld [vmem:[#allocation5 + $0x44] sm:$0xf] }
 0x1c9   :  { %v1484_v42 = vpop.f32.mrf.mxu0  ;;  %v3546_v31 = vor.u32 %v3876_v29, %v3545_v28 }
 0x1ca   :  { %v3582_v42 = vor.u32 %v3885_v41, %v3581_v39  ;;  %v1605_v54 = vadd.f32 %v4072_v47, %v4076_v38 }
 0x1cb   :  { %2410 = vmatpush.bf16.msra.mxu2 %v3546_v31 }
 0x1cc   :  { %v1618_v56 = vadd.f32 %v4074_v40, %v1605_v54 }
 0x1cd   :  { %v1861_v45 = vpop.f32.mrf.mxu3 }
 0x1ce   :  { %v1862_v46 = vadd.f32 %v1861_v45, %v1848_v36  ;;  %v3875_v36 = vld [vmem:[#allocation5 + $0x88] sm:$0xf0]  ;;  %v3884_v45 = vld [vmem:[#allocation5 + $0x598] sm:$0xf0] }
 0x1cf   :  { %v1497_v49 = vpop.f32.mrf.mxu1  ;;  %v1850_v50 = vpop.f32.mrf.mxu2  ;;  %v3542_v37 = vor.u32 %v3875_v36, %v3541_v35 }
 0x1d0   :  { %v1866_v51 = vadd.f32 %v1862_v46, %v4060_v3  ;;  %v3578_v46 = vor.u32 %v3884_v45, %v3577_v44  ;;  %v3573_v49 = vld [vmem:[#allocation5 + $0x4c4] sm:$0xf]  ;;  %v3883_v50 = vld [vmem:[#allocation5 + $0x508] sm:$0xf0] }
 0x1d1   :  { %v1822_v55 = vpop.f32.mrf.mxu0  ;;  %2411 = vmatpush.bf16.msra.mxu2 %v3542_v37 }
 0x1d2   :  { %v1868_v48 = vmax.f32 %v1866_v51, 0.0  ;;  %v3574_v51 = vor.u32 %v3883_v50, %v3573_v49 }
 0x1d4   :  { %v1870_v60 = vpack.c.bf16 %v1868_v48, %v1868_v48 }
 0x1d5   :  { %v1863_v61 = vpop.f32.mrf.mxu3 }
 0x1d6   :  { %2020 = vmatmul.bf16.vlgmr.msrb.gmra.mxu1 %v1870_v60  ;;  %2239 = vmatmul.bf16.vlgmr.msrb.gmra.mxu3 %v1870_v60 }
 0x1d7   :  { %v1835_v57 = vpop.f32.mrf.mxu1 }
 0x1d8   :  { %v1836_v62 = vadd.f32 %v1835_v57, %v1822_v55 }
 0x1d9   :  { %v1824_v63 = vpop.f32.mrf.mxu0 }
 0x1da   :  { %v1865_v0 = vadd.f32 %v1836_v62, %v4058_v58  ;;  %v3889_v58 = vld [vmem:[#allocation5 + $0x868] sm:$0xf0] }
 0x1db   :  { %v3598_v14 = vor.u32 %v3889_v58, %v3597_v13 }
 0x1dc   :  { %v1867_v3 = vmax.f32 %v1865_v0, 0.0 }
 0x1dd   :  { %2418 = vmatpush.bf16.msra.mxu3 %v3598_v14 }
 0x1de   :  { %v1869_v6 = vpack.c.bf16 %v1867_v3, %v1867_v3 }
 0x1df   :  { %v1837_v1 = vpop.f32.mrf.mxu1 }
 0x1e0   :  { %2007 = vmatmul.bf16.vlgmr.msrb.gmra.mxu0 %v1869_v6  ;;  %2226 = vmatmul.bf16.vlgmr.msrb.gmra.mxu2 %v1869_v6 }
 0x1e1   :  { %2419 = vmatpush.bf16.msra.mxu3 %v3594_v20 }
 0x1e5   :  { %2420 = vmatpush.bf16.msra.mxu3 %v3590_v27 }
 0x1e6   :  { %2265 = vmatmul.bf16.vlgmr.msra.gmra.mxu1 %v1870_v60 }
 0x1e9   :  { %2421 = vmatpush.bf16.msra.mxu3 %v3586_v34 }
 0x1ed   :  { %2422 = vmatpush.bf16.msra.mxu3 %v3582_v42 }
 0x1f0   :  { %2252 = vmatmul.bf16.vlgmr.msra.gmra.mxu0 %v1869_v6 }
 0x1f1   :  { %2423 = vmatpush.bf16.msra.mxu3 %v3578_v46 }
 0x1f5   :  { %2424 = vmatpush.bf16.msra.mxu3 %v3574_v51 }
 0x253   :  { %v2021_v52 = vpop.f32.mrf.mxu1 }
 0x259   :  { %v2240_v53 = vpop.f32.mrf.mxu3 }
 0x25b   :  { %v2023_v55 = vpop.f32.mrf.mxu1 }
 0x25d   :  { %v2008_v43 = vpop.f32.mrf.mxu0 }
 0x25e   :  { %v2022_v48 = vadd.f32 %v2021_v52, %v2008_v43 }
 0x260   :  { %v2025_v59 = vadd.f32 %v2022_v48, %v1618_v56 }
 0x261   :  { %v2242_v60 = vpop.f32.mrf.mxu3 }
 0x263   :  { %v2227_v61 = vpop.f32.mrf.mxu2  ;;  %v2266_v57 = vpop.f32.mrf.mxu1 }
 0x264   :  { %v2241_v62 = vadd.f32 %v2240_v53, %v2227_v61 }
 0x265   :  { %v2010_v63 = vpop.f32.mrf.mxu0 }
 0x266   :  { %v2270_v0 = vadd.f32 %v2241_v62, %v4066_v18 }
 0x268   :  { %v2272_v3 = vmax.f32 %v2270_v0, 0.0 }
 0x26a   :  { %v2274_v6 = vpack.c.bf16 %v2272_v3, %v2272_v3 }
 0x26b   :  { %v2229_v1 = vpop.f32.mrf.mxu2  ;;  %v2268_v2 = vpop.f32.mrf.mxu1 }
 0x26c   :  { %2412 = vmatmul.bf16.vlgmr.msra.gmra.mxu2 %v2274_v6 }
 0x26d   :  { %v2253_v4 = vpop.f32.mrf.mxu0 }
 0x26e   :  { %v2267_v47 = vadd.f32 %v2266_v57, %v2253_v4 }
 0x270   :  { %v2271_v38 = vadd.f32 %v2267_v47, %v4068_v22 }
 0x272   :  { %v2273_v5 = vmax.f32 %v2271_v38, 0.0 }
 0x274   :  { %v2275_v40 = vpack.c.bf16 %v2273_v5, %v2273_v5 }
 0x275   :  { %v2255_v7 = vpop.f32.mrf.mxu0 }
 0x276   :  { %2425 = vmatmul.bf16.vlgmr.msra.gmra.mxu3 %v2275_v40 }
 0x2ef   :  { %v2413_v8 = vpop.f32.mrf.mxu2 }
 0x2f7   :  { %v2415_v9 = vpop.f32.mrf.mxu2 }
 0x2f9   :  { %v2426_v10 = vpop.f32.mrf.mxu3 }
 0x2fa   :  { %v2427_v11 = vadd.f32 %v2426_v10, %v2413_v8 }
 0x2fc   :  { %v2430_v18 = vadd.f32 %v2427_v11, %v2025_v59 }
 0x2fe   :  { %v2431_v13 = vadd.f32 %v2430_v18, %v68_v12 }
 0x300   :  { %2432 = vst [vmem:[#allocation8] sm:$0xff] %v2431_v13 }
 0x301   :  { %v2428_v22 = vpop.f32.mrf.mxu3  ;;  %2443 = dma.vmem_to_hbm [thread:$0]  %s2439_s2, 128, %s2441_s30, [#allocation4]  }
 0x302   :  { %3997 = dma.done.wait [#allocation4], 128  }
 0x303   :  { %3998 = vsyncadd [#allocation4], 4294967168 }
 0x304   :  { %2448 = vsyncpa [#allocation3], 1 }
 0x305   :  { %2449 = vsyncpa [#allocation6], 1 }
 0x306   :  { %2450 = vsyncpa [#allocation4], 1 }

</bundles_post_ra>
